<compile_context>
chip_gen: v7x
topology: tpu7x:2x2x1
jax: 0.10.0
libtpu: 0.0.40
codegen_flags: <defaults>
</compile_context>

<pallas_src>
import jax
import jax.numpy as jnp
from jax.experimental import pallas as pl
from jax.experimental.pallas import tpu as pltpu


def _round_up(x, m):
    return (x + m - 1) // m * m


def adaptable_basic_block(x_nchw, w1_oihw, bn1_params, w2_oihw, bn2_params,
                          eps=1e-5, num_steps=None):
    """Eval-mode forward of AdaptableBasicBlockWithDeathRate.

    x_nchw: (N, C, H, W) float32, conv weights OIHW (bias-free),
    bn params = (gamma, beta, running_mean, running_var).
    Requires inplanes == planes, stride == 1 (identity residual).
    num_steps: grid steps (images are split into N/num_steps fused groups);
               default 2 (one per v7x TensorCore), use 1 on v5e/v6e for
               minimum per-step overhead.
    """
    gamma1, beta1, mean1, var1 = bn1_params
    gamma2, beta2, mean2, var2 = bn2_params

    N, Cin, H, W = x_nchw.shape
    Cout = w1_oihw.shape[0]
    assert Cin == Cout, "identity residual path requires inplanes == planes"

    if num_steps is None:
        num_steps = 2 if (N >= 2 and N % 2 == 0) else 1
    assert N % num_steps == 0, "batch must divide evenly into grid steps"
    NB = N // num_steps                     # images fused per grid step

    Hp, Wp = H + 2, W + 2
    HALO = Wp + 1                           # flat offset of the (1,1) interior origin
    SMAX = 2 * Wp + 2                       # largest tap shift (dy = dx = 2)
    LW = _round_up(Hp * Wp, 128)            # per-image lane-dense length (also stride)
    GL = NB * LW                            # fused group interior lane width
    GX = _round_up(GL + SMAX, 128)          # extended group width (tap reads in-bounds)
    EXT = _round_up(HALO, 128)              # zero halo on each side of conv2 scratch
    MIDW = EXT + GL + EXT

    # --- fold eval-mode BN into conv weights / biases (plain-JAX glue) ---
    s1 = gamma1 / jnp.sqrt(var1 + eps)
    b1 = (beta1 - mean1 * s1).astype(jnp.float32).reshape(Cout, 1)
    s2 = gamma2 / jnp.sqrt(var2 + eps)
    b2 = (beta2 - mean2 * s2).astype(jnp.float32).reshape(Cout, 1)

    # OIHW -> (O, kh, kw, I) -> (O, 9*I): rows scaled by BN scale, bf16 for the MXU.
    w1_mat = (jnp.transpose(w1_oihw.astype(jnp.float32) * s1[:, None, None, None],
                            (0, 2, 3, 1))
              .reshape(Cout, 9 * Cin).astype(jnp.bfloat16))
    w2_mat = (jnp.transpose(w2_oihw.astype(jnp.float32) * s2[:, None, None, None],
                            (0, 2, 3, 1))
              .reshape(Cout, 9 * Cout).astype(jnp.bfloat16))

    # NCHW -> zero-pad H/W by 1 -> flatten -> per-image LW lanes -> fuse NB images
    # per group along the lane axis (stride LW) -> right-extend -> bf16.
    x_pad = jnp.pad(x_nchw.astype(jnp.float32), ((0, 0), (0, 0), (1, 1), (1, 1)))
    x_flat = jnp.pad(x_pad.reshape(N, Cin, Hp * Wp),
                     ((0, 0), (0, 0), (0, LW - Hp * Wp)))
    xg = (x_flat.reshape(num_steps, NB, Cin, LW)
                .transpose(0, 2, 1, 3)
                .reshape(num_steps, Cin, GL))
    x_big = jnp.pad(xg, ((0, 0), (0, 0), (0, GX - GL))).astype(jnp.bfloat16)

    # Valid-position mask (1.0 inside the H x W image), tiled per fused image; it
    # also provides conv2's zero halo for out-of-image columns/rows and neutralizes
    # cross-image tap reads.
    idx = jnp.arange(LW)
    m1 = (((idx // Wp) < H) & ((idx % Wp) < W)).astype(jnp.float32)
    mask = jnp.tile(m1, NB).reshape(1, GL)

    shifts = tuple(dy * Wp + dx for dy in range(3) for dx in range(3))

    def kernel(x_ref, w1_ref, b1_ref, w2_ref, b2_ref, m_ref, out_ref, mid_ref):
        m = m_ref[...]                                        # (1, GL) f32

        # conv1 (+ folded bn1) + relu1: one bf16 MXU matmul, K = 9*Cin, over all
        # NB fused images.  The center tap (shift == HALO) doubles as residual.
        center = x_ref[0, :, HALO:HALO + GL]                  # (Cin, GL) bf16
        taps1 = [center if s == HALO else x_ref[0, :, s:s + GL] for s in shifts]
        rhs1 = jnp.concatenate(taps1, axis=0)                 # (9*Cin, GL) bf16
        r1 = jnp.dot(w1_ref[...], rhs1, preferred_element_type=jnp.float32)
        r1 = jnp.maximum(r1 + b1_ref[...], 0.0) * m           # bias + relu, zero halo/junk

        # Stash intermediate (bf16) between lane-aligned zero halos; only the
        # small halos are zeroed, the interior store is fully aligned.
        mid_ref[:, :EXT] = jnp.zeros((Cout, EXT), jnp.bfloat16)
        mid_ref[:, EXT + GL:] = jnp.zeros((Cout, EXT), jnp.bfloat16)
        mid_ref[:, EXT:EXT + GL] = r1.astype(jnp.bfloat16)

        # conv2 (+ folded bn2): taps are lane-offset reads around the interior.
        taps2 = [mid_ref[:, EXT - HALO + s: EXT - HALO + s + GL] for s in shifts]
        rhs2 = jnp.concatenate(taps2, axis=0)                 # (9*Cout, GL) bf16
        r2 = jnp.dot(w2_ref[...], rhs2, preferred_element_type=jnp.float32)
        r2 = r2 + b2_ref[...]

        # residual add + relu2 (identity path == the already-sliced center tap).
        out_ref[0] = jnp.maximum(center.astype(jnp.float32) + r2, 0.0)

    out_g = pl.pallas_call(
        kernel,
        out_shape=jax.ShapeDtypeStruct((num_steps, Cout, GL), jnp.float32),
        grid_spec=pltpu.PrefetchScalarGridSpec(
            num_scalar_prefetch=0,
            grid=(num_steps,),
            in_specs=[
                pl.BlockSpec((1, Cin, GX), lambda g: (g, 0, 0)),       # x group (bf16)
                pl.BlockSpec((Cout, 9 * Cin), lambda g: (0, 0)),       # w1 (BN folded)
                pl.BlockSpec((Cout, 1), lambda g: (0, 0)),             # b1
                pl.BlockSpec((Cout, 9 * Cout), lambda g: (0, 0)),      # w2 (BN folded)
                pl.BlockSpec((Cout, 1), lambda g: (0, 0)),             # b2
                pl.BlockSpec((1, GL), lambda g: (0, 0)),               # valid mask
            ],
            out_specs=pl.BlockSpec((1, Cout, GL), lambda g: (g, 0, 0)),
            scratch_shapes=[pltpu.VMEM((Cout, MIDW), jnp.bfloat16)],
        ),
        compiler_params=pltpu.CompilerParams(
            dimension_semantics=("parallel",),
        ),
    )(x_big, w1_mat, b1, w2_mat, b2, mask)

    # fused lane-dense slab -> (N, C, H, W)
    out = (out_g.reshape(num_steps, Cout, NB, LW)
                .transpose(0, 2, 1, 3)
                .reshape(N, Cout, LW))
    out = out[:, :, :Hp * Wp].reshape(N, Cout, Hp, Wp)[:, :, :H, :W]
    return out


def _reference(x, w1, bn1_params, w2, bn2_params, eps=1e-5):
    """Pure-JAX f32 reference (lax.conv) of the eval-mode forward, NCHW."""
    gamma1, beta1, mean1, var1 = bn1_params
    gamma2, beta2, mean2, var2 = bn2_params
    dn = ('NCHW', 'OIHW', 'NCHW')
    r = jax.lax.conv_general_dilated(x, w1, (1, 1), ((1, 1), (1, 1)),
                                     dimension_numbers=dn)
    r = (r - mean1[None, :, None, None]) / jnp.sqrt(var1 + eps)[None, :, None, None]
    r = r * gamma1[None, :, None, None] + beta1[None, :, None, None]
    r = jnp.maximum(r, 0.0)
    r = jax.lax.conv_general_dilated(r, w2, (1, 1), ((1, 1), (1, 1)),
                                     dimension_numbers=dn)
    r = (r - mean2[None, :, None, None]) / jnp.sqrt(var2 + eps)[None, :, None, None]
    r = r * gamma2[None, :, None, None] + beta2[None, :, None, None]
    return jnp.maximum(x + r, 0.0)


if __name__ == "__main__":
    key = jax.random.PRNGKey(0)
    kx, kw1, kw2, kg1, kb1, km1, kv1, kg2, kb2, km2, kv2 = jax.random.split(key, 11)

    # CIFAR-stage sizes: inplanes == planes == 16, stride == 1.
    # N=4 so the default 2-step grid fuses 2 images per step.
    N, C, H, W = 4, 16, 16, 16
    x = jax.random.normal(kx, (N, C, H, W), jnp.float32)

    # conv3x3 weights (OIHW, bias=False)
    w1 = jax.random.normal(kw1, (C, C, 3, 3), jnp.float32) * 0.1
    w2 = jax.random.normal(kw2, (C, C, 3, 3), jnp.float32) * 0.1

    # BatchNorm2d parameters (eval mode uses running stats)
    bn1 = (jax.random.uniform(kg1, (C,), jnp.float32, 0.5, 1.5),   # gamma
           jax.random.normal(kb1, (C,), jnp.float32) * 0.1,        # beta
           jax.random.normal(km1, (C,), jnp.float32) * 0.1,        # running_mean
           jax.random.uniform(kv1, (C,), jnp.float32, 0.5, 1.5))   # running_var
    bn2 = (jax.random.uniform(kg2, (C,), jnp.float32, 0.5, 1.5),
           jax.random.normal(kb2, (C,), jnp.float32) * 0.1,
           jax.random.normal(km2, (C,), jnp.float32) * 0.1,
           jax.random.uniform(kv2, (C,), jnp.float32, 0.5, 1.5))

    out = jax.block_until_ready(adaptable_basic_block(x, w1, bn1, w2, bn2))
    ref = jax.block_until_ready(_reference(x, w1, bn1, w2, bn2))

    assert out.shape == (N, C, H, W)
    # bf16 MXU operands / bf16 input slab -> intended inference precision;
    # looser tolerance than the pure-f32 reference is required, not incidental.
    err = jnp.max(jnp.abs(out - ref))
    assert jnp.allclose(out, ref, atol=5e-2, rtol=5e-2), f"max abs err = {err}"

    print("KERNEL_OK")
</pallas_src>

<mosaic_0001>
module attributes {stable_mosaic.version = 11 : i64} {
  func.func @kernel(%arg0: i32, %arg1: memref<1x16x896xbf16, #tpu.memory_space<vmem>>, %arg2: memref<16x144xbf16, #tpu.memory_space<vmem>>, %arg3: memref<16x1xf32, #tpu.memory_space<vmem>>, %arg4: memref<16x144xbf16, #tpu.memory_space<vmem>>, %arg5: memref<16x1xf32, #tpu.memory_space<vmem>>, %arg6: memref<1x768xf32, #tpu.memory_space<vmem>>, %arg7: memref<1x16x768xf32, #tpu.memory_space<vmem>>, %arg8: memref<16x1024xbf16, #tpu.memory_space<vmem>>) attributes {dimension_semantics = [#tpu.dimension_semantics<parallel>], iteration_bounds = array<i64: 2>, scalar_prefetch = 0 : i64, scratch_operands = 1 : i64, tpu.core_type = #tpu.core_type<tc>, window_params = [{transform_indices = @transform_0, window_bounds = array<i64: 1, 16, 896>}, {pipeline_mode = #tpu.pipeline_mode<synchronous>, transform_indices = @transform_1, window_bounds = array<i64: 16, 144>}, {pipeline_mode = #tpu.pipeline_mode<synchronous>, transform_indices = @transform_2, window_bounds = array<i64: 16, 1>}, {pipeline_mode = #tpu.pipeline_mode<synchronous>, transform_indices = @transform_3, window_bounds = array<i64: 16, 144>}, {pipeline_mode = #tpu.pipeline_mode<synchronous>, transform_indices = @transform_4, window_bounds = array<i64: 16, 1>}, {pipeline_mode = #tpu.pipeline_mode<synchronous>, transform_indices = @transform_5, window_bounds = array<i64: 1, 768>}, {transform_indices = @transform_6, window_bounds = array<i64: 1, 16, 768>}]} {
    %c0 = arith.constant 0 : index
    %c0_0 = arith.constant 0 : index
    %0 = vector.load %arg6[%c0, %c0_0] : memref<1x768xf32, #tpu.memory_space<vmem>>, vector<1x768xf32>
    %c0_1 = arith.constant 0 : index
    %c0_2 = arith.constant 0 : index
    %c19 = arith.constant 19 : index
    %1 = vector.load %arg1[%c0_1, %c0_2, %c19] : memref<1x16x896xbf16, #tpu.memory_space<vmem>>, vector<1x16x768xbf16>
    %2 = vector.shape_cast %1 : vector<1x16x768xbf16> to vector<16x768xbf16>
    %c0_3 = arith.constant 0 : index
    %c0_4 = arith.constant 0 : index
    %c0_5 = arith.constant 0 : index
    %3 = vector.load %arg1[%c0_3, %c0_4, %c0_5] : memref<1x16x896xbf16, #tpu.memory_space<vmem>>, vector<1x16x768xbf16>
    %4 = vector.shape_cast %3 : vector<1x16x768xbf16> to vector<16x768xbf16>
    %c0_6 = arith.constant 0 : index
    %c0_7 = arith.constant 0 : index
    %c1 = arith.constant 1 : index
    %5 = vector.load %arg1[%c0_6, %c0_7, %c1] : memref<1x16x896xbf16, #tpu.memory_space<vmem>>, vector<1x16x768xbf16>
    %6 = vector.shape_cast %5 : vector<1x16x768xbf16> to vector<16x768xbf16>
    %c0_8 = arith.constant 0 : index
    %c0_9 = arith.constant 0 : index
    %c2 = arith.constant 2 : index
    %7 = vector.load %arg1[%c0_8, %c0_9, %c2] : memref<1x16x896xbf16, #tpu.memory_space<vmem>>, vector<1x16x768xbf16>
    %8 = vector.shape_cast %7 : vector<1x16x768xbf16> to vector<16x768xbf16>
    %c0_10 = arith.constant 0 : index
    %c0_11 = arith.constant 0 : index
    %c18 = arith.constant 18 : index
    %9 = vector.load %arg1[%c0_10, %c0_11, %c18] : memref<1x16x896xbf16, #tpu.memory_space<vmem>>, vector<1x16x768xbf16>
    %10 = vector.shape_cast %9 : vector<1x16x768xbf16> to vector<16x768xbf16>
    %c0_12 = arith.constant 0 : index
    %c0_13 = arith.constant 0 : index
    %c20 = arith.constant 20 : index
    %11 = vector.load %arg1[%c0_12, %c0_13, %c20] : memref<1x16x896xbf16, #tpu.memory_space<vmem>>, vector<1x16x768xbf16>
    %12 = vector.shape_cast %11 : vector<1x16x768xbf16> to vector<16x768xbf16>
    %c0_14 = arith.constant 0 : index
    %c0_15 = arith.constant 0 : index
    %c36 = arith.constant 36 : index
    %13 = vector.load %arg1[%c0_14, %c0_15, %c36] : memref<1x16x896xbf16, #tpu.memory_space<vmem>>, vector<1x16x768xbf16>
    %14 = vector.shape_cast %13 : vector<1x16x768xbf16> to vector<16x768xbf16>
    %c0_16 = arith.constant 0 : index
    %c0_17 = arith.constant 0 : index
    %c37 = arith.constant 37 : index
    %15 = vector.load %arg1[%c0_16, %c0_17, %c37] : memref<1x16x896xbf16, #tpu.memory_space<vmem>>, vector<1x16x768xbf16>
    %16 = vector.shape_cast %15 : vector<1x16x768xbf16> to vector<16x768xbf16>
    %c0_18 = arith.constant 0 : index
    %c0_19 = arith.constant 0 : index
    %c38 = arith.constant 38 : index
    %17 = vector.load %arg1[%c0_18, %c0_19, %c38] : memref<1x16x896xbf16, #tpu.memory_space<vmem>>, vector<1x16x768xbf16>
    %18 = vector.shape_cast %17 : vector<1x16x768xbf16> to vector<16x768xbf16>
    %19 = tpu.concatenate %4, %6, %8, %10, %2, %12, %14, %16, %18 in 0 : vector<16x768xbf16>, vector<16x768xbf16>, vector<16x768xbf16>, vector<16x768xbf16>, vector<16x768xbf16>, vector<16x768xbf16>, vector<16x768xbf16>, vector<16x768xbf16>, vector<16x768xbf16> -> vector<144x768xbf16>
    %c0_20 = arith.constant 0 : index
    %c0_21 = arith.constant 0 : index
    %20 = vector.load %arg2[%c0_20, %c0_21] : memref<16x144xbf16, #tpu.memory_space<vmem>>, vector<16x144xbf16>
    %cst = arith.constant dense<0.000000e+00> : vector<16x768xf32>
    %21 = tpu.matmul %20, %19, %cst {dimension_numbers = #tpu.dot_dimension_numbers<[1], [0], [0], [1], [0, 0, 1, 1], [], []>} : vector<16x144xbf16>, vector<144x768xbf16>, vector<16x768xf32> -> vector<16x768xf32>
    %c0_22 = arith.constant 0 : index
    %c0_23 = arith.constant 0 : index
    %22 = vector.load %arg3[%c0_22, %c0_23] : memref<16x1xf32, #tpu.memory_space<vmem>>, vector<16x1xf32>
    %23 = vector.broadcast %22 : vector<16x1xf32> to vector<16x768xf32>
    %24 = arith.addf %21, %23 : vector<16x768xf32>
    %cst_24 = arith.constant 0.000000e+00 : f32
    %25 = vector.broadcast %cst_24 : f32 to vector<16x768xf32>
    %26 = arith.maximumf %24, %25 : vector<16x768xf32>
    %27 = vector.broadcast %0 : vector<1x768xf32> to vector<16x768xf32>
    %28 = arith.mulf %26, %27 : vector<16x768xf32>
    %cst_25 = arith.constant 0.000000e+00 : bf16
    %29 = vector.broadcast %cst_25 : bf16 to vector<16x128xbf16>
    %c0_26 = arith.constant 0 : index
    %c0_27 = arith.constant 0 : index
    %30 = vector.load %arg8[%c0_26, %c0_27] : memref<16x1024xbf16, #tpu.memory_space<vmem>>, vector<16x128xbf16>
    tpu.vector_store %arg8[%c0_26, %c0_27], %29 {strides = array<i32>} : memref<16x1024xbf16, #tpu.memory_space<vmem>>, vector<16x128xbf16>,
    %cst_28 = arith.constant 0.000000e+00 : bf16
    %31 = vector.broadcast %cst_28 : bf16 to vector<16x128xbf16>
    %c0_29 = arith.constant 0 : index
    %c896 = arith.constant 896 : index
    %32 = vector.load %arg8[%c0_29, %c896] : memref<16x1024xbf16, #tpu.memory_space<vmem>>, vector<16x128xbf16>
    tpu.vector_store %arg8[%c0_29, %c896], %31 {strides = array<i32>} : memref<16x1024xbf16, #tpu.memory_space<vmem>>, vector<16x128xbf16>,
    %33 = arith.truncf %28 : vector<16x768xf32> to vector<16x768xbf16>
    %c0_30 = arith.constant 0 : index
    %c128 = arith.constant 128 : index
    %34 = vector.load %arg8[%c0_30, %c128] : memref<16x1024xbf16, #tpu.memory_space<vmem>>, vector<16x768xbf16>
    tpu.vector_store %arg8[%c0_30, %c128], %33 {strides = array<i32>} : memref<16x1024xbf16, #tpu.memory_space<vmem>>, vector<16x768xbf16>,
    %c0_31 = arith.constant 0 : index
    %c109 = arith.constant 109 : index
    %35 = vector.load %arg8[%c0_31, %c109] : memref<16x1024xbf16, #tpu.memory_space<vmem>>, vector<16x768xbf16>
    %c0_32 = arith.constant 0 : index
    %c110 = arith.constant 110 : index
    %36 = vector.load %arg8[%c0_32, %c110] : memref<16x1024xbf16, #tpu.memory_space<vmem>>, vector<16x768xbf16>
    %c0_33 = arith.constant 0 : index
    %c111 = arith.constant 111 : index
    %37 = vector.load %arg8[%c0_33, %c111] : memref<16x1024xbf16, #tpu.memory_space<vmem>>, vector<16x768xbf16>
    %c0_34 = arith.constant 0 : index
    %c127 = arith.constant 127 : index
    %38 = vector.load %arg8[%c0_34, %c127] : memref<16x1024xbf16, #tpu.memory_space<vmem>>, vector<16x768xbf16>
    %c0_35 = arith.constant 0 : index
    %c128_36 = arith.constant 128 : index
    %39 = vector.load %arg8[%c0_35, %c128_36] : memref<16x1024xbf16, #tpu.memory_space<vmem>>, vector<16x768xbf16>
    %c0_37 = arith.constant 0 : index
    %c129 = arith.constant 129 : index
    %40 = vector.load %arg8[%c0_37, %c129] : memref<16x1024xbf16, #tpu.memory_space<vmem>>, vector<16x768xbf16>
    %c0_38 = arith.constant 0 : index
    %c145 = arith.constant 145 : index
    %41 = vector.load %arg8[%c0_38, %c145] : memref<16x1024xbf16, #tpu.memory_space<vmem>>, vector<16x768xbf16>
    %c0_39 = arith.constant 0 : index
    %c146 = arith.constant 146 : index
    %42 = vector.load %arg8[%c0_39, %c146] : memref<16x1024xbf16, #tpu.memory_space<vmem>>, vector<16x768xbf16>
    %c0_40 = arith.constant 0 : index
    %c147 = arith.constant 147 : index
    %43 = vector.load %arg8[%c0_40, %c147] : memref<16x1024xbf16, #tpu.memory_space<vmem>>, vector<16x768xbf16>
    %44 = tpu.concatenate %35, %36, %37, %38, %39, %40, %41, %42, %43 in 0 : vector<16x768xbf16>, vector<16x768xbf16>, vector<16x768xbf16>, vector<16x768xbf16>, vector<16x768xbf16>, vector<16x768xbf16>, vector<16x768xbf16>, vector<16x768xbf16>, vector<16x768xbf16> -> vector<144x768xbf16>
    %c0_41 = arith.constant 0 : index
    %c0_42 = arith.constant 0 : index
    %45 = vector.load %arg4[%c0_41, %c0_42] : memref<16x144xbf16, #tpu.memory_space<vmem>>, vector<16x144xbf16>
    %cst_43 = arith.constant dense<0.000000e+00> : vector<16x768xf32>
    %46 = tpu.matmul %45, %44, %cst_43 {dimension_numbers = #tpu.dot_dimension_numbers<[1], [0], [0], [1], [0, 0, 1, 1], [], []>} : vector<16x144xbf16>, vector<144x768xbf16>, vector<16x768xf32> -> vector<16x768xf32>
    %c0_44 = arith.constant 0 : index
    %c0_45 = arith.constant 0 : index
    %47 = vector.load %arg5[%c0_44, %c0_45] : memref<16x1xf32, #tpu.memory_space<vmem>>, vector<16x1xf32>
    %48 = vector.broadcast %47 : vector<16x1xf32> to vector<16x768xf32>
    %49 = arith.addf %46, %48 : vector<16x768xf32>
    %50 = arith.extf %2 : vector<16x768xbf16> to vector<16x768xf32>
    %51 = arith.addf %50, %49 : vector<16x768xf32>
    %cst_46 = arith.constant 0.000000e+00 : f32
    %52 = vector.broadcast %cst_46 : f32 to vector<16x768xf32>
    %53 = arith.maximumf %51, %52 : vector<16x768xf32>
    %c0_47 = arith.constant 0 : index
    %c0_48 = arith.constant 0 : index
    %c0_49 = arith.constant 0 : index
    %54 = vector.load %arg7[%c0_47, %c0_48, %c0_49] : memref<1x16x768xf32, #tpu.memory_space<vmem>>, vector<1x16x768xf32>
    %55 = vector.shape_cast %54 : vector<1x16x768xf32> to vector<16x768xf32>
    %56 = vector.shape_cast %53 : vector<16x768xf32> to vector<1x16x768xf32>
    tpu.vector_store %arg7[%c0_47, %c0_48, %c0_49], %56 {strides = array<i32>} : memref<1x16x768xf32, #tpu.memory_space<vmem>>, vector<1x16x768xf32>,
    return
  }
  func.func @transform_0(%arg0: i32) -> (i32, i32, i32) {
    %c0_i32 = arith.constant 0 : i32
    %c0_i32_0 = arith.constant 0 : i32
    %c0_i32_1 = arith.constant 0 : i32
    return %arg0, %c0_i32, %c0_i32_0 : i32, i32, i32
  }
  func.func @transform_1(%arg0: i32) -> (i32, i32) {
    %c0_i32 = arith.constant 0 : i32
    %c0_i32_0 = arith.constant 0 : i32
    %c0_i32_1 = arith.constant 0 : i32
    return %c0_i32, %c0_i32_0 : i32, i32
  }
  func.func @transform_2(%arg0: i32) -> (i32, i32) {
    %c0_i32 = arith.constant 0 : i32
    %c0_i32_0 = arith.constant 0 : i32
    %c0_i32_1 = arith.constant 0 : i32
    return %c0_i32, %c0_i32_0 : i32, i32
  }
  func.func @transform_3(%arg0: i32) -> (i32, i32) {
    %c0_i32 = arith.constant 0 : i32
    %c0_i32_0 = arith.constant 0 : i32
    %c0_i32_1 = arith.constant 0 : i32
    return %c0_i32, %c0_i32_0 : i32, i32
  }
  func.func @transform_4(%arg0: i32) -> (i32, i32) {
    %c0_i32 = arith.constant 0 : i32
    %c0_i32_0 = arith.constant 0 : i32
    %c0_i32_1 = arith.constant 0 : i32
    return %c0_i32, %c0_i32_0 : i32, i32
  }
  func.func @transform_5(%arg0: i32) -> (i32, i32) {
    %c0_i32 = arith.constant 0 : i32
    %c0_i32_0 = arith.constant 0 : i32
    %c0_i32_1 = arith.constant 0 : i32
    return %c0_i32, %c0_i32_0 : i32, i32
  }
  func.func @transform_6(%arg0: i32) -> (i32, i32, i32) {
    %c0_i32 = arith.constant 0 : i32
    %c0_i32_0 = arith.constant 0 : i32
    %c0_i32_1 = arith.constant 0 : i32
    return %arg0, %c0_i32, %c0_i32_0 : i32, i32, i32
  }
}

</mosaic_0001>

<bundles_post_ra>
// kernel: tpu_custom_call.1
= control target key start
LH: loop header
LB: loop body
LE: loop exit
PB: predicated region body
PF: predicated region fallthrough
CT: control target
= control target key end

     0   :  { %11 = vsyncpa [#allocation4], 0  ;;  %s2712_s0 = inlined_call_operand.hbm [shape: bf16[2,16,896], index: 0, kind: input, shape index: {}]   ;;  %s2713_s1 = inlined_call_operand.vmem [shape: bf16[16,144], index: 1, kind: input, shape index: {}]   ;;  %s2714_s2 = inlined_call_operand.vmem [shape: f32[16,1], index: 2, kind: input, shape index: {}]   ;;  %s2715_s3 = inlined_call_operand.vmem [shape: bf16[16,144], index: 3, kind: input, shape index: {}]   ;;  %s2716_s4 = inlined_call_operand.vmem [shape: f32[16,1], index: 4, kind: input, shape index: {}]   ;;  %s2717_s5 = inlined_call_operand.vmem [shape: f32[1,768], index: 5, kind: input, shape index: {}]   ;;  %s2718_s6 = inlined_call_operand.hbm [shape: f32[2,16,768], index: 6, kind: output, shape index: {}]  }
   0x1   :  { %13 = vsyncpa [#allocation4 + $0x1], 0 }
   0x2   :  { %14 = vsyncpa [#allocation5], 0 }
   0x3   :  { %16 = vsyncpa [#allocation5 + $0x1], 0  ;;  %s1898_s21 = smov 0   ;;  %s1900_s22 = smov 0  }
   0x4   :  { %s1902_s23 = smov 0   ;;  %s1904_s24 = smov 0  }
   0x5 LB: > { %s1919_s25 = sadd.s32 4294967295, %s1845_s24   ;;  %s1630_s26 = sadd.s32 4294967294, %s1845_s24   ;;  %s1845_s24 = sphi %s1904_s24, %s2730_s24   ;;  %s1841_s23 = sphi %s1902_s23, %s2729_s23   ;;  %s1837_s22 = sphi %s1900_s22, %s2728_s22   ;;  %s1833_s21 = sphi %s1898_s21, %s2727_s21  }
   0x6   : > { %s1923_s27 = sadd.s32 1, %s1845_s24   ;;  %s29_s28 = sadd.s32 1, %s1841_s23 }
   0x7   : > { %s26_s29 = ssub.s32 %s1845_s24, %s1923_s27  ;;  %p36_p0 = scmp.ne.s32.totalorder %s1841_s23, %s1837_s22 }
   0x8   : > { %p27_p1 = scmp.eq.s32.totalorder %s26_s29, 0  ;;  %p37_p2 = scmp.eq.s32.totalorder %s1845_s24, 0 }
   0x9   : > { %p42_p3 = scmp.ne.s32.totalorder %s1837_s22, %s1833_s21  ;;  %p43_p4 = scmp.eq.s32.totalorder %s1919_s25, 0 }
   0xa   : > { %s1935_s30 = scalar_select %p27_p1, %s1841_s23, %s29_s28  }
   0xb   : > { %p38_p5 = por %p37_p2, %p36_p0  ;;  %p1937_p6 = por %p43_p4, %p42_p3 }
   0xc   : > { %p171_p7 = scmp.eq.s32.totalorder %s1919_s25, 1  ;;  %p177_p8 = scmp.eq.s32.totalorder %s1630_s26, 1 }
   0xd   : > { %p1678_p10 = scmp.lt.s32.totalorder %s1845_s24, 2  ;;  %s212_s10 = sand.u32 1, %s1841_s23  }
   0xe   : > { %p1944_p11 = por %p171_p7, %p36_p0  ;;  %p1948_p12 = por %p177_p8, %p42_p3 }
   0xf   : > { %s1662_s11 = smul.u32 896, %s1845_s24  ;;  %p1959_p13 = pnand %p1678_p10, %p38_p5 }
  0x10   : > { %s2721_s8 = scalar_select %p1944_p11, 1, 0 }
  0x11   : > { %s2722_s9 = scalar_select %p1948_p12, 1, 0 }
  0x12   : > { %s1661_s12 = smul.u32 56, %s212_s10  ;;  %s1957_s15 = scalar_lea.hbm %s2712_s0, %s1662_s11 }
  0x13   : > { %s1965_s19 = scalar_lea.sflag [#allocation4], %s212_s10  ;;  %s1749_s20 = scalar_lea.hbm %s1957_s15, 896 }
  0x14   : > { %s216_s17 = scalar_lea.vmem [#allocation3], %s1661_s12  ;;  %p1750_p0 = scmp.ne.s32.totalorder %s1957_s15, %s1749_s20 }
  0x15   : > { %s223_s18 = sshll.u32 %s216_s17, 4  ;;  %p1751_p1 = pneg %p1959_p13  ;;  %s1963_s18 = int_to_ptr.vmem [resolvable:$true] %s223_s18 }
  0x16   : > { %s1754_s29 = scalar_lea.hbm %s2712_s0, 1792  ;;  %p1755_p4 = scmp.lt.u32.totalorder %s1957_s15, %s2712_s0 }
  0x17   : > { %p1752_p2 = pnand %p1751_p1, %p1750_p0  ;;  %p1756_p5 = scmp.lt.u32.totalorder %s1754_s29, %s1749_s20 }
  0x18   : > { %p1758_p8 = scmp.lt.u32.totalorder %s1749_s20, %s1957_s15 }
  0x19   : > { %p1753_p3 = pneg %p1752_p2  ;;  %p1757_p7 = por %p1756_p5, %p1755_p4 }
  0x1b   : > { %p1759_p10 = por %p1758_p8, %p1757_p7 }
  0x1d   : > { %p1760_p9 = pnand %p1759_p10, %p1753_p3 }
  0x1f   : > { %1763 = shalt.err (!%p1760_p9)
}
  0x20   : > { %s1764_s10 = scalar_lea.vmem %s1963_s18, 896  ;;  %s1847_s12 = smov [#allocation3]  }
  0x21   : > { %p1765_p0 = scmp.ne.s32.totalorder %s1963_s18, %s1764_s10  ;;  %s1769_s14 = sshll.u32 %s1847_s12, 4  ;;  %s1770_s14 = int_to_ptr.vmem [resolvable:$false] %s1769_s14 }
  0x22   : > { %s1771_s17 = scalar_lea.vmem %s1770_s14, 1792  ;;  %p1772_p11 = scmp.lt.s32.totalorder %s1963_s18, %s1770_s14 }
  0x23   : > { %p1767_p2 = pnand %p1765_p0, %p1751_p1  ;;  %p1773_p4 = scmp.lt.s32.totalorder %s1771_s17, %s1764_s10 }
  0x25   : > { %p1768_p12 = pneg %p1767_p2  ;;  %p1774_p5 = por %p1773_p4, %p1772_p11 }
  0x27   : > { %p1775_p7 = pnand %p1774_p5, %p1768_p12 }
  0x29   : > { %1778 = shalt.err (!%p1775_p7)
}
  0x2a   : > { %s1848_s20 = smov 448   ;;  %s1849_s26 = smov 28  }
  0x2b   : > { %1673 = dma.hbm_to_vmem [thread:$0]  (!%p1959_p13), %s1957_s15, 896, %s1963_s18, %s1965_s19, %s1848_s20, %s1848_s20, %s1849_s26  }
  0x2c   : > { %p1634_p9 = scmp.ge.s32.totalorder %s1845_s24, 1  ;;  %p231_p1 = scmp.lt.s32.totalorder %s1845_s24, 3 }
  0x2e   : > { %p232_p3 = pnand %p1634_p9, %p231_p1 }
  0x2f   : > { %s1996_s28 = sand.u32 (!%p232_p3), 1, %s1837_s22  }
  0x30   : > { %235 = sbr.rel (%p232_p3) target bundleno = 1335 (0x537), region = 44  ;;  %s238_s11 = scalar_lea.sflag (!%p232_p3), [#allocation4], %s1996_s28 }
  0x31   : > { %s1663_s29 = smul.u32 (!%p232_p3), 56, %s1996_s28 }
  0x33   : > { %s2000_s13 = scalar_lea.vmem (!%p232_p3), [#allocation3], %s1663_s29 }
  0x37   : > { %1824 = dma.done.wait (%p1937_p6), %s238_s11, 896  }
  0x38   : > { %1826 = vsyncadd (%p1937_p6), %s238_s11, 4294966400  ;;  %v272_v0 = vld [vmem:[%s2000_s13] sm:$0xff]  ;;  %v273_v2 = vld [vmem:[%s2000_s13 + $0x8] sm:$0xff]  ;;  %s1850_s15 = smov 127   ;;  %s1851_s7 = smov 126   ;;  %vm584_vm0 = vcmask 130048  }
  0x39   : > { %v276_v1 = vld [vmem:[%s2000_s13 + $0x1c] sm:$0xff]  ;;  %v277_v5 = vld [vmem:[%s2000_s13 + $0x24] sm:$0xff]  ;;  %v274_v8 = vld [vmem:[%s2000_s13 + $0x10] sm:$0xff]  ;;  %s1852_s16 = smov 110   ;;  %s1853_s18 = smov 109   ;;  %v1858_v16 = vmov 0  }
  0x3a   : > { %v1642_v3 = vcombine.high %v272_v0, %v276_v1  ;;  %v1641_v4 = vcombine.low %v272_v0, %v276_v1  ;;  %v1644_v6 = vcombine.high %v273_v2, %v277_v5  ;;  %v1643_v7 = vcombine.low %v273_v2, %v277_v5  ;;  %v278_v9 = vld [vmem:[%s2000_s13 + $0x2c] sm:$0xff]  ;;  %s1854_s19 = smov 108   ;;  %s1855_s10 = smov 92   ;;  %v275_v12 = vld [vmem:[%s2000_s13 + $0x18] sm:$0xf]  ;;  %1726 = vset.pattern.permute.xlu0 %v1858_v16 }
  0x3b   : > { %v2016_v10 = vcombine.low %v274_v8, %v278_v9  ;;  %s1856_s12 = smov 91   ;;  %v2055_v11 = vld [vmem:[%s2713_s1 + $0x4] ss:$8 sps:$4 sm:$0xff]   ;;  %s1857_s20 = smov 90   ;;  %v2073_v14 = vcombine.high %v274_v8, %v278_v9  ;;  %1727 = vset.pattern.permute.xlu1 %v1858_v16  ;;  %vm359_vm1 = vcmask 1039360   ;;  %vm386_vm2 = vcmask 1031168  }
  0x3c   : > { %347 = vrot.lane.b32.xlu0 %v1642_v3, %s1850_s15  ;;  %345 = vrot.lane.b32.xlu1 %v1641_v4, %s1850_s15  ;;  %v279_v13 = vld [vmem:[%s2000_s13 + $0x34] sm:$0xf]  ;;  %v563_v17 = vld [vmem:[%s2714_s2] sm:$0xff]  ;;  %vm413_vm3 = vcmask 900096   ;;  %vm440_vm4 = vcmask 891904   ;;  %vm467_vm5 = vcmask 883712  }
  0x3d   : > { %588 = vmatprep.subr.bf16.mxu0 %v1642_v3  ;;  %631 = vmatprep.subr.bf16.mxu1 %v1644_v6  ;;  %v1647_v15 = vcombine.low %v275_v12, %v279_v13  ;;  %v564_v18 = vld [vmem:[%s2714_s2 + $0x8] sm:$0xff]  ;;  %vm494_vm6 = vcmask 752640   ;;  %vm521_vm7 = vcmask 744448   ;;  %vm548_vm8 = vcmask 736256   ;;  %s1859_s29 = smov 19   ;;  %p2724_p11 = scmp.ne.s32.totalorder %s2721_s8, 0 }
  0x3e   : > { %589 = vmatpush1.bf16.msra.mxu0 %v1641_v4  ;;  %632 = vmatpush1.bf16.msra.mxu1 %v1643_v7  ;;  %vm1120_vm9 = vcmask 154624  }
  0x3f   : > { %1650 = vmatprep.mubr.msk.bf16.mxu0 %vm584_vm0, %v2055_v11  ;;  %1651 = vmatprep.mubr.msk.bf16.mxu1 %vm584_vm0, %v2055_v11 }
  0x40   : > { %349 = vrot.lane.b32.xlu0 %v1643_v7, %s1850_s15  ;;  %351 = vrot.lane.b32.xlu1 %v1644_v6, %s1850_s15 }
  0x44   : > { %353 = vrot.lane.b32.xlu0 %v2016_v10, %s1850_s15  ;;  %374 = vrot.lane.b32.xlu1 %v1642_v3, %s1851_s7 }
  0x48   : > { %376 = vrot.lane.b32.xlu0 %v1643_v7, %s1851_s7  ;;  %372 = vrot.lane.b32.xlu1 %v1641_v4, %s1851_s7 }
  0x4c   : > { %378 = vrot.lane.b32.xlu0 %v1644_v6, %s1851_s7  ;;  %380 = vrot.lane.b32.xlu1 %v2016_v10, %s1851_s7 }
  0x50   : > { %401 = vrot.lane.b32.xlu0 %v1642_v3, %s1852_s16  ;;  %403 = vrot.lane.b32.xlu1 %v1643_v7, %s1852_s16 }
  0x54   : > { %399 = vrot.lane.b32.xlu0 %v1641_v4, %s1852_s16  ;;  %405 = vrot.lane.b32.xlu1 %v1644_v6, %s1852_s16 }
  0x58   : > { %407 = vrot.lane.b32.xlu0 %v2016_v10, %s1852_s16  ;;  %428 = vrot.lane.b32.xlu1 %v1642_v3, %s1853_s18 }
  0x5c   : > { %430 = vrot.lane.b32.xlu0 %v1643_v7, %s1853_s18  ;;  %426 = vrot.lane.b32.xlu1 %v1641_v4, %s1853_s18 }
  0x60   : > { %432 = vrot.lane.b32.xlu0 %v1644_v6, %s1853_s18  ;;  %434 = vrot.lane.b32.xlu1 %v2016_v10, %s1853_s18 }
  0x64   : > { %455 = vrot.lane.b32.xlu0 %v1642_v3, %s1854_s19  ;;  %457 = vrot.lane.b32.xlu1 %v1643_v7, %s1854_s19 }
  0x68   : > { %453 = vrot.lane.b32.xlu0 %v1641_v4, %s1854_s19  ;;  %459 = vrot.lane.b32.xlu1 %v1644_v6, %s1854_s19 }
  0x6c   : > { %461 = vrot.lane.b32.xlu0 %v2016_v10, %s1854_s19  ;;  %482 = vrot.lane.b32.xlu1 %v1642_v3, %s1855_s10 }
  0x70   : > { %484 = vrot.lane.b32.xlu0 %v1643_v7, %s1855_s10  ;;  %480 = vrot.lane.b32.xlu1 %v1641_v4, %s1855_s10 }
  0x74   : > { %486 = vrot.lane.b32.xlu0 %v1644_v6, %s1855_s10  ;;  %488 = vrot.lane.b32.xlu1 %v2016_v10, %s1855_s10 }
  0x78   : > { %509 = vrot.lane.b32.xlu0 %v1642_v3, %s1856_s12  ;;  %511 = vrot.lane.b32.xlu1 %v1643_v7, %s1856_s12 }
  0x7c   : > { %507 = vrot.lane.b32.xlu0 %v1641_v4, %s1856_s12  ;;  %513 = vrot.lane.b32.xlu1 %v1644_v6, %s1856_s12 }
  0x80   : > { %515 = vrot.lane.b32.xlu0 %v2016_v10, %s1856_s12  ;;  %536 = vrot.lane.b32.xlu1 %v1642_v3, %s1857_s20 }
  0x84   : > { %538 = vrot.lane.b32.xlu0 %v1643_v7, %s1857_s20  ;;  %534 = vrot.lane.b32.xlu1 %v1641_v4, %s1857_s20 }
  0x88   : > { %540 = vrot.lane.b32.xlu0 %v1644_v6, %s1857_s20  ;;  %542 = vrot.lane.b32.xlu1 %v2016_v10, %s1857_s20 }
  0x8c   : > { %355 = vrot.lane.b32.xlu0 %v2073_v14, %s1850_s15  ;;  %357 = vrot.lane.b32.xlu1 %v1647_v15, %s1850_s15 }
  0x90   : > { %382 = vrot.lane.b32.xlu0 %v2073_v14, %s1851_s7  ;;  %384 = vrot.lane.b32.xlu1 %v1647_v15, %s1851_s7 }
  0x94   : > { %409 = vrot.lane.b32.xlu0 %v2073_v14, %s1852_s16  ;;  %411 = vrot.lane.b32.xlu1 %v1647_v15, %s1852_s16 }
  0x98   : > { %436 = vrot.lane.b32.xlu0 %v2073_v14, %s1853_s18  ;;  %438 = vrot.lane.b32.xlu1 %v1647_v15, %s1853_s18 }
  0x9c   : > { %463 = vrot.lane.b32.xlu0 %v2073_v14, %s1854_s19  ;;  %465 = vrot.lane.b32.xlu1 %v1647_v15, %s1854_s19 }
  0xa0   : > { %490 = vrot.lane.b32.xlu0 %v2073_v14, %s1855_s10  ;;  %492 = vrot.lane.b32.xlu1 %v1647_v15, %s1855_s10 }
  0xa4   : > { %517 = vrot.lane.b32.xlu0 %v2073_v14, %s1856_s12  ;;  %519 = vrot.lane.b32.xlu1 %v1647_v15, %s1856_s12 }
  0xa8   : > { %544 = vrot.lane.b32.xlu0 %v2073_v14, %s1857_s20  ;;  %546 = vrot.lane.b32.xlu1 %v1647_v15, %s1857_s20 }
  0xac   : > { %567 = vperm.xlu0 %1726, %v563_v17   ;;  %572 = vperm.xlu1 %1727, %v564_v18  }
  0xae   : > { %v348_v19 = vpop.permute.xlu0 %347  ;;  %v346_v20 = vpop.permute.xlu1 %345 }
  0xaf   : > { %v360_v24 = vsel %vm359_vm1, %v346_v20, %v348_v19 }
  0xb0   : > { %807 = vrot.lane.b32.xlu0 %v1858_v16, %s1850_s15  ;;  %903 = vrot.lane.b32.xlu1 %v1858_v16, %s1854_s19 }
  0xb2   : > { %v350_v21 = vpop.permute.xlu0 %349  ;;  %v352_v22 = vpop.permute.xlu1 %351 }
  0xb3   : > { %v361_v23 = vsel %vm359_vm1, %v348_v19, %v350_v21  ;;  %v362_v28 = vsel %vm359_vm1, %v350_v21, %v352_v22 }
  0xb4   : > { %590 = vmatprep.subr.bf16.mxu0 %v361_v23  ;;  %827 = vrot.lane.b32.xlu0 %v1858_v16, %s1851_s7 }
  0xb5   : > { %591 = vmatpush1.bf16.msra.mxu0 %v360_v24  ;;  %923 = vrot.lane.b32.xlu1 %v1858_v16, %s1855_s10 }
  0xb6   : > { %v2117_v25 = vpop.permute.xlu0 %353  ;;  %v375_v26 = vpop.permute.xlu1 %374 }
  0xb7   : > { %v363_v27 = vsel %vm359_vm1, %v352_v22, %v2117_v25 }
  0xb8   : > { %633 = vmatprep.subr.bf16.mxu1 %v363_v27  ;;  %847 = vrot.lane.b32.xlu0 %v1858_v16, %s1852_s16 }
  0xb9   : > { %634 = vmatpush1.bf16.msra.mxu1 %v362_v28  ;;  %963 = vrot.lane.b32.xlu1 %v1858_v16, %s1857_s20  ;;  %v1737_v28 = vld [vmem:[%s2713_s1] ss:$8 sps:$4 sm:$0xff]  }
  0xba   : > { %v377_v29 = vpop.permute.xlu0 %376  ;;  %v373_v30 = vpop.permute.xlu1 %372 }
  0xbb   : > { %v388_v31 = vsel %vm386_vm2, %v375_v26, %v377_v29  ;;  %v387_v32 = vsel %vm386_vm2, %v373_v30, %v375_v26 }
  0xbc   : > { %592 = vmatprep.subr.bf16.mxu0 %v388_v31  ;;  %994 = vrot.lane.b32.xlu0 %v1858_v16, %s1859_s29 }
  0xbd   : > { %593 = vmatpush1.bf16.msra.mxu0 %v387_v32 }
  0xbe   : > { %v379_v33 = vpop.permute.xlu0 %378  ;;  %v2128_v34 = vpop.permute.xlu1 %380 }
  0xbf   : > { %v390_v35 = vsel %vm386_vm2, %v379_v33, %v2128_v34  ;;  %v389_v36 = vsel %vm386_vm2, %v377_v29, %v379_v33 }
  0xc0   : > { %635 = vmatprep.subr.bf16.mxu1 %v390_v35  ;;  %943 = vrot.lane.b32.xlu0 %v1858_v16, %s1856_s12 }
  0xc1   : > { %636 = vmatpush1.bf16.msra.mxu1 %v389_v36 }
  0xc2   : > { %v402_v37 = vpop.permute.xlu0 %401  ;;  %v404_v38 = vpop.permute.xlu1 %403 }
  0xc3   : > { %v415_v39 = vsel %vm413_vm3, %v402_v37, %v404_v38 }
  0xc4   : > { %594 = vmatprep.subr.bf16.mxu0 %v415_v39 }
  0xc6   : > { %v400_v40 = vpop.permute.xlu0 %399  ;;  %v406_v41 = vpop.permute.xlu1 %405 }
  0xc7   : > { %v414_v42 = vsel %vm413_vm3, %v400_v40, %v402_v37  ;;  %v416_v46 = vsel %vm413_vm3, %v404_v38, %v406_v41 }
  0xc8   : > { %595 = vmatpush1.bf16.msra.mxu0 %v414_v42 }
  0xca   : > { %v2135_v43 = vpop.permute.xlu0 %407  ;;  %v429_v44 = vpop.permute.xlu1 %428 }
  0xcb   : > { %v417_v45 = vsel %vm413_vm3, %v406_v41, %v2135_v43 }
  0xcc   : > { %637 = vmatprep.subr.bf16.mxu1 %v417_v45 }
  0xcd   : > { %638 = vmatpush1.bf16.msra.mxu1 %v416_v46 }
  0xce   : > { %v431_v47 = vpop.permute.xlu0 %430  ;;  %v427_v48 = vpop.permute.xlu1 %426 }
  0xcf   : > { %v442_v49 = vsel %vm440_vm4, %v429_v44, %v431_v47  ;;  %v441_v50 = vsel %vm440_vm4, %v427_v48, %v429_v44 }
  0xd0   : > { %596 = vmatprep.subr.bf16.mxu0 %v442_v49 }
  0xd1   : > { %597 = vmatpush1.bf16.msra.mxu0 %v441_v50 }
  0xd2   : > { %v433_v51 = vpop.permute.xlu0 %432  ;;  %v2142_v52 = vpop.permute.xlu1 %434 }
  0xd3   : > { %v444_v53 = vsel %vm440_vm4, %v433_v51, %v2142_v52  ;;  %v443_v54 = vsel %vm440_vm4, %v431_v47, %v433_v51 }
  0xd4   : > { %639 = vmatprep.subr.bf16.mxu1 %v444_v53 }
  0xd5   : > { %640 = vmatpush1.bf16.msra.mxu1 %v443_v54 }
  0xd6   : > { %v456_v55 = vpop.permute.xlu0 %455  ;;  %v458_v56 = vpop.permute.xlu1 %457 }
  0xd7   : > { %v469_v57 = vsel %vm467_vm5, %v456_v55, %v458_v56 }
  0xd8   : > { %598 = vmatprep.subr.bf16.mxu0 %v469_v57 }
  0xda   : > { %v454_v58 = vpop.permute.xlu0 %453  ;;  %v460_v59 = vpop.permute.xlu1 %459 }
  0xdb   : > { %v468_v60 = vsel %vm467_vm5, %v454_v58, %v456_v55  ;;  %v470_v0 = vsel %vm467_vm5, %v458_v56, %v460_v59 }
  0xdc   : > { %599 = vmatpush1.bf16.msra.mxu0 %v468_v60 }
  0xde   : > { %v2149_v61 = vpop.permute.xlu0 %461  ;;  %v483_v62 = vpop.permute.xlu1 %482 }
  0xdf   : > { %v471_v63 = vsel %vm467_vm5, %v460_v59, %v2149_v61 }
  0xe0   : > { %641 = vmatprep.subr.bf16.mxu1 %v471_v63 }
  0xe1   : > { %642 = vmatpush1.bf16.msra.mxu1 %v470_v0  ;;  %v271_v0 = vld [vmem:[%s2717_s5] sm:$0x3f] }
  0xe2   : > { %v485_v1 = vpop.permute.xlu0 %484  ;;  %v481_v2 = vpop.permute.xlu1 %480 }
  0xe3   : > { %v496_v3 = vsel %vm494_vm6, %v483_v62, %v485_v1  ;;  %v495_v4 = vsel %vm494_vm6, %v481_v2, %v483_v62 }
  0xe4   : > { %600 = vmatprep.subr.bf16.mxu0 %v496_v3 }
  0xe5   : > { %601 = vmatpush1.bf16.msra.mxu0 %v495_v4 }
  0xe6   : > { %v487_v5 = vpop.permute.xlu0 %486  ;;  %v2156_v6 = vpop.permute.xlu1 %488 }
  0xe7   : > { %v498_v7 = vsel %vm494_vm6, %v487_v5, %v2156_v6  ;;  %v497_v8 = vsel %vm494_vm6, %v485_v1, %v487_v5 }
  0xe8   : > { %643 = vmatprep.subr.bf16.mxu1 %v498_v7 }
  0xe9   : > { %644 = vmatpush1.bf16.msra.mxu1 %v497_v8 }
  0xea   : > { %v510_v9 = vpop.permute.xlu0 %509  ;;  %v512_v12 = vpop.permute.xlu1 %511 }
  0xeb   : > { %v523_v13 = vsel %vm521_vm7, %v510_v9, %v512_v12 }
  0xec   : > { %602 = vmatprep.subr.bf16.mxu0 %v523_v13 }
  0xee   : > { %v508_v15 = vpop.permute.xlu0 %507  ;;  %v514_v17 = vpop.permute.xlu1 %513 }
  0xef   : > { %v522_v18 = vsel %vm521_vm7, %v508_v15, %v510_v9  ;;  %v524_v22 = vsel %vm521_vm7, %v512_v12, %v514_v17 }
  0xf0   : > { %603 = vmatpush1.bf16.msra.mxu0 %v522_v18 }
  0xf2   : > { %v2163_v19 = vpop.permute.xlu0 %515  ;;  %v537_v20 = vpop.permute.xlu1 %536 }
  0xf3   : > { %v525_v21 = vsel %vm521_vm7, %v514_v17, %v2163_v19 }
  0xf4   : > { %645 = vmatprep.subr.bf16.mxu1 %v525_v21 }
  0xf5   : > { %646 = vmatpush1.bf16.msra.mxu1 %v524_v22 }
  0xf6   : > { %v539_v23 = vpop.permute.xlu0 %538  ;;  %v535_v24 = vpop.permute.xlu1 %534 }
  0xf7   : > { %v550_v26 = vsel %vm548_vm8, %v537_v20, %v539_v23  ;;  %v549_v27 = vsel %vm548_vm8, %v535_v24, %v537_v20 }
  0xf8   : > { %604 = vmatprep.subr.bf16.mxu0 %v550_v26 }
  0xf9   : > { %605 = vmatpush1.bf16.msra.mxu0 %v549_v27 }
  0xfa   : > { %v541_v29 = vpop.permute.xlu0 %540  ;;  %v543_v30 = vpop.permute.xlu1 %542  ;;  %674 = vmatprep.subr.bf16.mxu0 %v2073_v14 }
  0xfb   : > { %v552_v31 = vsel %vm548_vm8, %v541_v29, %v543_v30  ;;  %v551_v32 = vsel %vm548_vm8, %v539_v23, %v541_v29 }
  0xfc   : > { %621 = vmatmul.mubr.bf16.vlgmr.msra.gmra.mrb[0].mxu0 %v1737_v28  ;;  %647 = vmatprep.subr.bf16.mxu1 %v552_v31 }
  0xfd   : > { %648 = vmatpush1.bf16.msra.mxu1 %v551_v32  ;;  %675 = vmatpush1.bf16.msra.mxu0 %v2016_v10 }
  0xfe   : > { %v356_v33 = vpop.permute.xlu0 %355  ;;  %v358_v35 = vpop.permute.xlu1 %357  ;;  %1652 = vmatprep.mubr.msk.bf16.mxu0 %vm584_vm0, %v2055_v11 }
  0xff   : > { %v365_v36 = vsel %vm359_vm1, %v356_v33, %v358_v35  ;;  %v364_v37 = vsel %vm359_vm1, %v2117_v25, %v356_v33 }
 0x100   : > { %664 = vmatmul.mubr.bf16.vlgmr.msra.gmra.mrb[0].mxu1 %v1737_v28  ;;  %676 = vmatprep.subr.bf16.mxu0 %v365_v36 }
 0x101   : > { %677 = vmatpush1.bf16.msra.mxu0 %v364_v37 }
 0x102   : > { %v383_v14 = vpop.permute.xlu0 %382  ;;  %v385_v38 = vpop.permute.xlu1 %384 }
 0x103   : > { %v392_v39 = vsel %vm386_vm2, %v383_v14, %v385_v38  ;;  %v391_v10 = vsel %vm386_vm2, %v2128_v34, %v383_v14 }
 0x104   : > { %678 = vmatprep.subr.bf16.mxu0 %v392_v39 }
 0x105   : > { %679 = vmatpush1.bf16.msra.mxu0 %v391_v10 }
 0x106   : > { %v410_v40 = vpop.permute.xlu0 %409  ;;  %v412_v41 = vpop.permute.xlu1 %411 }
 0x107   : > { %v419_v11 = vsel %vm413_vm3, %v410_v40, %v412_v41  ;;  %v418_v42 = vsel %vm413_vm3, %v2135_v43, %v410_v40 }
 0x108   : > { %680 = vmatprep.subr.bf16.mxu0 %v419_v11 }
 0x109   : > { %681 = vmatpush1.bf16.msra.mxu0 %v418_v42 }
 0x10a   : > { %v437_v25 = vpop.permute.xlu0 %436  ;;  %v439_v44 = vpop.permute.xlu1 %438 }
 0x10b   : > { %v446_v45 = vsel %vm440_vm4, %v437_v25, %v439_v44  ;;  %v445_v46 = vsel %vm440_vm4, %v2142_v52, %v437_v25 }
 0x10c   : > { %682 = vmatprep.subr.bf16.mxu0 %v446_v45 }
 0x10d   : > { %683 = vmatpush1.bf16.msra.mxu0 %v445_v46 }
 0x10e   : > { %v464_v34 = vpop.permute.xlu0 %463  ;;  %v466_v47 = vpop.permute.xlu1 %465 }
 0x10f   : > { %v473_v48 = vsel %vm467_vm5, %v464_v34, %v466_v47  ;;  %v472_v49 = vsel %vm467_vm5, %v2149_v61, %v464_v34  ;;  %v730_v61 = vlaneseq }
 0x110   : > { %684 = vmatprep.subr.bf16.mxu0 %v473_v48 }
 0x111   : > { %685 = vmatpush1.bf16.msra.mxu0 %v472_v49  ;;  %v731_v62 = vshrl.u32 %v730_v61, 7 }
 0x112   : > { %v491_v43 = vpop.permute.xlu0 %490  ;;  %v493_v50 = vpop.permute.xlu1 %492 }
 0x113   : > { %v500_v51 = vsel %vm494_vm6, %v491_v43, %v493_v50  ;;  %v499_v53 = vsel %vm494_vm6, %v2156_v6, %v491_v43  ;;  %v748_v63 = vsub.s32 4, %v731_v62  ;;  %v752_v1 = vsub.s32 5, %v731_v62 }
 0x114   : > { %686 = vmatprep.subr.bf16.mxu0 %v500_v51  ;;  %v732_v5 = vsub.s32 0, %v731_v62  ;;  %v736_v7 = vsub.s32 1, %v731_v62  ;;  %v740_v15 = vsub.s32 2, %v731_v62  ;;  %v744_v17 = vsub.s32 3, %v731_v62 }
 0x115   : > { %687 = vmatpush1.bf16.msra.mxu0 %v499_v53  ;;  %v2209_v2 = vrot.slane %v271_v0, %v748_v63  ;;  %v2211_v3 = vrot.slane %v271_v0, %v752_v1 }
 0x116   : > { %v518_v52 = vpop.permute.xlu0 %517  ;;  %v520_v54 = vpop.permute.xlu1 %519  ;;  %v737_v23 = vrot.slane %v271_v0, %v736_v7  ;;  %v741_v31 = vrot.slane %v271_v0, %v740_v15  ;;  %v745_v33 = vrot.slane %v271_v0, %v744_v17 }
 0x117   : > { %v527_v55 = vsel %vm521_vm7, %v518_v52, %v520_v54  ;;  %v526_v56 = vsel %vm521_vm7, %v2163_v19, %v518_v52  ;;  %v733_v19 = vrot.slane %v271_v0, %v732_v5 }
 0x118   : > { %688 = vmatprep.subr.bf16.mxu0 %v527_v55 }
 0x119   : > { %689 = vmatpush1.bf16.msra.mxu0 %v526_v56 }
 0x11a   : > { %v545_v57 = vpop.permute.xlu0 %544  ;;  %v547_v58 = vpop.permute.xlu1 %546 }
 0x11b   : > { %v554_v59 = vsel %vm548_vm8, %v545_v57, %v547_v58  ;;  %v553_v60 = vsel %vm548_vm8, %v543_v30, %v545_v57 }
 0x11c   : > { %690 = vmatprep.subr.bf16.mxu0 %v554_v59 }
 0x11d   : > { %691 = vmatpush1.bf16.msra.mxu0 %v553_v60 }
 0x120   : > { %707 = vmatmul.mubr.bf16.vlgmr.msra.gmra.mrb[4].mxu0 %v1737_v28 }
 0x12b   : > { %v2213_v4 = vpop.permute.xlu0 %567  ;;  %v2215_v8 = vpop.permute.xlu1 %572 }
 0x12f   : > { %v2283_v7 = vpop.permute.xlu1 %903 }
 0x1cf   : > { %v622_v6 = vpop.f32.mrb[0].mxu0 }
 0x1d0   : > { %v623_v16 = vadd.f32 %v622_v6, %v2213_v4  ;;  %v624_v9 = vpop.f32.mrb[1].mxu0 }
 0x1d1   : > { %v625_v12 = vadd.f32 %v624_v9, %v2213_v4  ;;  %v626_v13 = vpop.f32.mrb[2].mxu0 }
 0x1d2   : > { %v717_v18 = vmax.f32 %v623_v16, 0.0  ;;  %v627_v20 = vadd.f32 %v626_v13, %v2215_v8  ;;  %v628_v21 = vpop.f32.mrb[3].mxu0  ;;  %v2289_v16 = vpop.permute.xlu1 %923 }
 0x1d3   : > { %v718_v22 = vmax.f32 %v625_v12, 0.0  ;;  %v629_v24 = vadd.f32 %v628_v21, %v2215_v8  ;;  %v665_v26 = vpop.f32.mrb[0].mxu1 }
 0x1d4   : > { %v723_v27 = vmax.f32 %v627_v20, 0.0  ;;  %v666_v28 = vadd.f32 %v665_v26, %v2213_v4  ;;  %v667_v29 = vpop.f32.mrb[1].mxu1  ;;  %v760_v36 = vmul.f32 %v733_v19, %v717_v18 }
 0x1d5   : > { %v724_v30 = vmax.f32 %v629_v24, 0.0  ;;  %v668_v32 = vadd.f32 %v667_v29, %v2213_v4  ;;  %v669_v35 = vpop.f32.mrb[2].mxu1  ;;  %v761_v10 = vmul.f32 %v737_v23, %v718_v22 }
 0x1d6   : > { %v766_v37 = vmul.f32 %v733_v19, %v723_v27  ;;  %v719_v14 = vmax.f32 %v666_v28, 0.0  ;;  %v670_v38 = vadd.f32 %v669_v35, %v2215_v8  ;;  %v671_v39 = vpop.f32.mrb[3].mxu1  ;;  %v2295_v12 = vpop.permute.xlu1 %963 }
 0x1d7   : > { %v767_v40 = vmul.f32 %v737_v23, %v724_v30  ;;  %v720_v41 = vmax.f32 %v668_v32, 0.0  ;;  %v672_v11 = vadd.f32 %v671_v39, %v2215_v8 }
 0x1d8   : > { %v774_v42 = vpack.c.bf16 %v766_v37, %v760_v36  ;;  %v725_v25 = vmax.f32 %v670_v38, 0.0  ;;  %v762_v46 = vmul.f32 %v741_v31, %v719_v14 }
 0x1d9   : > { %v775_v44 = vpack.c.bf16 %v767_v40, %v761_v10  ;;  %v726_v45 = vmax.f32 %v672_v11, 0.0  ;;  %v763_v47 = vmul.f32 %v745_v33, %v720_v41 }
 0x1da   : > { %v768_v34 = vmul.f32 %v741_v31, %v725_v25  ;;  %891 = vrot.lane.b32.xlu0 %v774_v42, %s1854_s19  ;;  %809 = vrot.lane.b32.xlu1 %v774_v42, %s1850_s15 }
 0x1db   : > { %v769_v48 = vmul.f32 %v745_v33, %v726_v45 }
 0x1dc   : > { %v776_v49 = vpack.c.bf16 %v768_v34, %v762_v46 }
 0x1dd   : > { %v777_v43 = vpack.c.bf16 %v769_v48, %v763_v47 }
 0x1de   : > { %895 = vrot.lane.b32.xlu0 %v776_v49, %s1854_s19  ;;  %813 = vrot.lane.b32.xlu1 %v776_v49, %s1850_s15 }
 0x1e2   : > { %931 = vrot.lane.b32.xlu0 %v774_v42, %s1856_s12  ;;  %829 = vrot.lane.b32.xlu1 %v774_v42, %s1851_s7 }
 0x1e6   : > { %935 = vrot.lane.b32.xlu0 %v776_v49, %s1856_s12  ;;  %833 = vrot.lane.b32.xlu1 %v776_v49, %s1851_s7 }
 0x1ea   : > { %996 = vrot.lane.b32.xlu0 %v774_v42, %s1859_s29  ;;  %849 = vrot.lane.b32.xlu1 %v774_v42, %s1852_s16 }
 0x1ee   : > { %811 = vrot.lane.b32.xlu0 %v775_v44, %s1850_s15  ;;  %853 = vrot.lane.b32.xlu1 %v776_v49, %s1852_s16 }
 0x1f2   : > { %831 = vrot.lane.b32.xlu0 %v775_v44, %s1851_s7  ;;  %867 = vrot.lane.b32.xlu1 %v774_v42, %s1853_s18 }
 0x1f3   : > { %v708_v50 = vpop.f32.mrb[4].mxu0 }
 0x1f4   : > { %v709_v51 = vadd.f32 %v708_v50, %v2213_v4  ;;  %v710_v53 = vpop.f32.mrb[5].mxu0 }
 0x1f5   : > { %v711_v52 = vadd.f32 %v710_v53, %v2213_v4  ;;  %v712_v54 = vpop.f32.mrb[6].mxu0 }
 0x1f6   : > { %v721_v55 = vmax.f32 %v709_v51, 0.0  ;;  %v713_v56 = vadd.f32 %v712_v54, %v2215_v8  ;;  %v714_v57 = vpop.f32.mrb[7].mxu0  ;;  %851 = vrot.lane.b32.xlu0 %v775_v44, %s1852_s16  ;;  %871 = vrot.lane.b32.xlu1 %v776_v49, %s1853_s18 }
 0x1f7   : > { %v722_v58 = vmax.f32 %v711_v52, 0.0  ;;  %v715_v59 = vadd.f32 %v714_v57, %v2215_v8 }
 0x1f8   : > { %v764_v60 = vmul.f32 %v2209_v2, %v721_v55  ;;  %v727_v61 = vmax.f32 %v713_v56, 0.0 }
 0x1f9   : > { %v765_v62 = vmul.f32 %v2211_v3, %v722_v58  ;;  %v728_v63 = vmax.f32 %v715_v59, 0.0 }
 0x1fa   : > { %v770_v0 = vmul.f32 %v2209_v2, %v727_v61  ;;  %869 = vrot.lane.b32.xlu0 %v775_v44, %s1853_s18  ;;  %911 = vrot.lane.b32.xlu1 %v774_v42, %s1855_s10  ;;  %v808_v2 = vpop.permute.xlu0 %807 }
 0x1fb   : > { %v771_v1 = vmul.f32 %v2211_v3, %v728_v63  ;;  %v2378_v63 = vld [vmem:[%s2715_s3 + $0x4] ss:$8 sps:$4 sm:$0xff]  }
 0x1fc   : > { %v778_v4 = vpack.c.bf16 %v770_v0, %v764_v60  ;;  %1655 = vmatprep.mubr.msk.bf16.mxu1 %vm584_vm0, %v2378_v63  ;;  %1656 = vmatprep.mubr.msk.bf16.mxu0 %vm584_vm0, %v2378_v63 }
 0x1fd   : > { %v779_v5 = vpack.c.bf16 %v771_v1, %v765_v62 }
 0x1fe   : > { %913 = vrot.lane.b32.xlu0 %v775_v44, %s1855_s10  ;;  %915 = vrot.lane.b32.xlu1 %v776_v49, %s1855_s10  ;;  %v828_v3 = vpop.permute.xlu0 %827 }
 0x202   : > { %953 = vrot.lane.b32.xlu0 %v775_v44, %s1857_s20  ;;  %951 = vrot.lane.b32.xlu1 %v774_v42, %s1857_s20  ;;  %v848_v6 = vpop.permute.xlu0 %847 }
 0x206   : > { %815 = vrot.lane.b32.xlu0 %v777_v43, %s1850_s15  ;;  %955 = vrot.lane.b32.xlu1 %v776_v49, %s1857_s20  ;;  %v2287_v8 = vpop.permute.xlu0 %994 }
 0x20a   : > { %855 = vrot.lane.b32.xlu0 %v777_v43, %s1852_s16  ;;  %1000 = vrot.lane.b32.xlu1 %v776_v49, %s1859_s29  ;;  %v2293_v9 = vpop.permute.xlu0 %943 }
 0x20e   : > { %897 = vrot.lane.b32.xlu0 %v777_v43, %s1854_s19  ;;  %893 = vrot.lane.b32.xlu1 %v775_v44, %s1854_s19 }
 0x212   : > { %917 = vrot.lane.b32.xlu0 %v777_v43, %s1855_s10  ;;  %933 = vrot.lane.b32.xlu1 %v775_v44, %s1856_s12 }
 0x216   : > { %957 = vrot.lane.b32.xlu0 %v777_v43, %s1857_s20  ;;  %835 = vrot.lane.b32.xlu1 %v777_v43, %s1851_s7 }
 0x21a   : > { %1002 = vrot.lane.b32.xlu0 %v777_v43, %s1859_s29  ;;  %873 = vrot.lane.b32.xlu1 %v777_v43, %s1853_s18 }
 0x21e   : > { %837 = vrot.lane.b32.xlu0 %v778_v4, %s1851_s7  ;;  %998 = vrot.lane.b32.xlu1 %v775_v44, %s1859_s29 }
 0x222   : > { %875 = vrot.lane.b32.xlu0 %v778_v4, %s1853_s18  ;;  %937 = vrot.lane.b32.xlu1 %v777_v43, %s1856_s12 }
 0x226   : > { %939 = vrot.lane.b32.xlu0 %v778_v4, %s1856_s12  ;;  %817 = vrot.lane.b32.xlu1 %v778_v4, %s1850_s15 }
 0x22a   : > { %819 = vrot.lane.b32.xlu0 %v779_v5, %s1850_s15  ;;  %857 = vrot.lane.b32.xlu1 %v778_v4, %s1852_s16 }
 0x22e   : > { %859 = vrot.lane.b32.xlu0 %v779_v5, %s1852_s16  ;;  %899 = vrot.lane.b32.xlu1 %v778_v4, %s1854_s19  ;;  %s1860_s16 = smov [#allocation6]  }
 0x232   : > { %901 = vrot.lane.b32.xlu0 %v779_v5, %s1854_s19  ;;  %919 = vrot.lane.b32.xlu1 %v778_v4, %s1855_s10  ;;  %s1783_s19 = sshll.u32 %s1860_s16, 4  ;;  %s1784_s19 = int_to_ptr.vmem [resolvable:$false] %s1783_s19 }
 0x236   : > { %921 = vrot.lane.b32.xlu0 %v779_v5, %s1855_s10  ;;  %959 = vrot.lane.b32.xlu1 %v778_v4, %s1857_s20  ;;  %s1785_s10 = scalar_lea.vmem %s1784_s19, 3072 }
 0x23a   : > { %961 = vrot.lane.b32.xlu0 %v779_v5, %s1857_s20  ;;  %1004 = vrot.lane.b32.xlu1 %v778_v4, %s1859_s29 }
 0x23e   : > { %1006 = vrot.lane.b32.xlu0 %v779_v5, %s1859_s29  ;;  %839 = vrot.lane.b32.xlu1 %v779_v5, %s1851_s7 }
 0x242   : > { %877 = vrot.lane.b32.xlu1 %v779_v5, %s1853_s18 }
 0x246   : > { %941 = vrot.lane.b32.xlu1 %v779_v5, %s1856_s12 }
 0x24c   : > { %v892_v13 = vpop.permute.xlu0 %891  ;;  %v810_v15 = vpop.permute.xlu1 %809 }
 0x24d   : > { %1064 = vrot.lane.b32.xlu1 %v892_v13, %s1859_s29  ;;  %v821_v23 = vsel %vm359_vm1, %v808_v2, %v810_v15 }
 0x250   : > { %v2298_v17 = vpop.permute.xlu0 %895  ;;  %v2300_v18 = vpop.permute.xlu1 %813 }
 0x254   : > { %v932_v19 = vpop.permute.xlu0 %931  ;;  %v830_v20 = vpop.permute.xlu1 %829 }
 0x255   : > { %1092 = vrot.lane.b32.xlu1 %v932_v19, %s1859_s29  ;;  %v841_v44 = vsel %vm386_vm2, %v828_v3, %v830_v20 }
 0x258   : > { %v2303_v21 = vpop.permute.xlu0 %935  ;;  %v2305_v22 = vpop.permute.xlu1 %833 }
 0x259   : > { %1008 = vrot.lane.b32.xlu1 %v821_v23, %s1859_s29 }
 0x25c   : > { %v2309_v24 = vpop.permute.xlu0 %996  ;;  %v850_v26 = vpop.permute.xlu1 %849 }
 0x25d   : > { %v861_v27 = vsel %vm413_vm3, %v848_v6, %v850_v26  ;;  %v1121_v6 = vsel %vm1120_vm9, %v2287_v8, %v2309_v24 }
 0x25e   : > { %1036 = vrot.lane.b32.xlu1 %v861_v27, %s1859_s29 }
 0x260   : > { %v812_v28 = vpop.permute.xlu0 %811  ;;  %v2313_v29 = vpop.permute.xlu1 %853 }
 0x261   : > { %v822_v30 = vsel %vm359_vm1, %v810_v15, %v812_v28  ;;  %v823_v34 = vsel %vm359_vm1, %v812_v28, %v2300_v18 }
 0x262   : > { %1010 = vrot.lane.b32.xlu1 %v822_v30, %s1859_s29 }
 0x264   : > { %v832_v31 = vpop.permute.xlu0 %831  ;;  %v868_v32 = vpop.permute.xlu1 %867 }
 0x265   : > { %1050 = vrot.lane.b32.xlu0 %v868_v32, %s1859_s29  ;;  %v843_v33 = vsel %vm386_vm2, %v832_v31, %v2305_v22  ;;  %v842_v49 = vsel %vm386_vm2, %v830_v20, %v832_v31 }
 0x266   : > { %1026 = vrot.lane.b32.xlu1 %v843_v33, %s1859_s29 }
 0x268   : > { %v852_v35 = vpop.permute.xlu0 %851  ;;  %v2321_v36 = vpop.permute.xlu1 %871 }
 0x269   : > { %v862_v37 = vsel %vm413_vm3, %v850_v26, %v852_v35  ;;  %v863_v53 = vsel %vm413_vm3, %v852_v35, %v2313_v29 }
 0x26a   : > { %1038 = vrot.lane.b32.xlu1 %v862_v37, %s1859_s29 }
 0x26c   : > { %v870_v14 = vpop.permute.xlu0 %869  ;;  %v912_v38 = vpop.permute.xlu1 %911 }
 0x26d   : > { %1078 = vrot.lane.b32.xlu0 %v912_v38, %s1859_s29  ;;  %v880_v39 = vsel %vm440_vm4, %v870_v14, %v2321_v36  ;;  %v879_v56 = vsel %vm440_vm4, %v868_v32, %v870_v14 }
 0x26e   : > { %1054 = vrot.lane.b32.xlu1 %v880_v39, %s1859_s29 }
 0x270   : > { %v914_v10 = vpop.permute.xlu0 %913  ;;  %v2329_v40 = vpop.permute.xlu1 %915 }
 0x271   : > { %v926_v52 = vsel %vm494_vm6, %v914_v10, %v2329_v40  ;;  %v925_v4 = vsel %vm494_vm6, %v912_v38, %v914_v10 }
 0x274   : > { %v954_v41 = vpop.permute.xlu0 %953  ;;  %v952_v11 = vpop.permute.xlu1 %951 }
 0x275   : > { %1106 = vrot.lane.b32.xlu0 %v952_v11, %s1859_s29  ;;  %v965_v8 = vsel %vm548_vm8, %v952_v11, %v954_v41 }
 0x278   : > { %v2332_v42 = vpop.permute.xlu0 %815  ;;  %v2334_v25 = vpop.permute.xlu1 %955 }
 0x279   : > { %1022 = vrot.lane.b32.xlu0 %v841_v44, %s1859_s29  ;;  %v966_v62 = vsel %vm548_vm8, %v954_v41, %v2334_v25  ;;  %v824_v5 = vsel %vm359_vm1, %v2300_v18, %v2332_v42 }
 0x27c   : > { %v2338_v45 = vpop.permute.xlu0 %855  ;;  %v1001_v46 = vpop.permute.xlu1 %1000 }
 0x27d   : > { %1012 = vrot.lane.b32.xlu0 %v823_v34, %s1859_s29  ;;  %v864_v23 = vsel %vm413_vm3, %v2313_v29, %v2338_v45 }
 0x280   : > { %v2343_v47 = vpop.permute.xlu0 %897  ;;  %v894_v48 = vpop.permute.xlu1 %893 }
 0x281   : > { %1024 = vrot.lane.b32.xlu0 %v842_v49, %s1859_s29  ;;  %v905_v43 = vsel %vm467_vm5, %v892_v13, %v894_v48  ;;  %v906_v60 = vsel %vm467_vm5, %v894_v48, %v2298_v17  ;;  %v907_v29 = vsel %vm467_vm5, %v2298_v17, %v2343_v47 }
 0x282   : > { %1066 = vrot.lane.b32.xlu1 %v905_v43, %s1859_s29 }
 0x284   : > { %v2349_v50 = vpop.permute.xlu0 %917  ;;  %v934_v51 = vpop.permute.xlu1 %933 }
 0x285   : > { %1040 = vrot.lane.b32.xlu0 %v863_v53, %s1859_s29  ;;  %v945_v57 = vsel %vm521_vm7, %v932_v19, %v934_v51  ;;  %v946_v18 = vsel %vm521_vm7, %v934_v51, %v2303_v21  ;;  %v927_v33 = vsel %vm494_vm6, %v2329_v40, %v2349_v50 }
 0x286   : > { %1082 = vrot.lane.b32.xlu1 %v926_v52, %s1859_s29 }
 0x288   : > { %v2357_v54 = vpop.permute.xlu0 %957  ;;  %v836_v55 = vpop.permute.xlu1 %835 }
 0x289   : > { %1052 = vrot.lane.b32.xlu0 %v879_v56, %s1859_s29  ;;  %v844_v19 = vsel %vm386_vm2, %v2305_v22, %v836_v55  ;;  %v967_v37 = vsel %vm548_vm8, %v2334_v25, %v2357_v54 }
 0x28a   : > { %1094 = vrot.lane.b32.xlu1 %v945_v57, %s1859_s29 }
 0x28c   : > { %v2363_v58 = vpop.permute.xlu0 %1002  ;;  %v2365_v59 = vpop.permute.xlu1 %873 }
 0x28d   : > { %1068 = vrot.lane.b32.xlu0 %v906_v60, %s1859_s29  ;;  %v1124_v61 = vsel %vm1120_vm9, %v1001_v46, %v2363_v58  ;;  %v881_v22 = vsel %vm440_vm4, %v2321_v36, %v2365_v59 }
 0x28e   : > { %1275 = vmatprep.subr.bf16.mxu0 %v1124_v61  ;;  %1110 = vrot.lane.b32.xlu1 %v966_v62, %s1859_s29 }
 0x290   : > { %v838_v0 = vpop.permute.xlu0 %837  ;;  %v999_v1 = vpop.permute.xlu1 %998 }
 0x291   : > { %1080 = vrot.lane.b32.xlu0 %v925_v4, %s1859_s29  ;;  %v1122_v2 = vsel %vm1120_vm9, %v2309_v24, %v999_v1  ;;  %v1123_v3 = vsel %vm1120_vm9, %v999_v1, %v1001_v46  ;;  %v845_v32 = vsel %vm386_vm2, %v836_v55, %v838_v0 }
 0x292   : > { %1014 = vrot.lane.b32.xlu1 %v824_v5, %s1859_s29  ;;  %1232 = vmatprep.subr.bf16.mxu1 %v1122_v2 }
 0x293   : > { %1276 = vmatpush1.bf16.msra.mxu0 %v1123_v3  ;;  %1233 = vmatpush1.bf16.msra.mxu1 %v1121_v6 }
 0x294   : > { %v876_v13 = vpop.permute.xlu0 %875  ;;  %v2394_v15 = vpop.permute.xlu1 %937 }
 0x295   : > { %1096 = vrot.lane.b32.xlu0 %v946_v18, %s1859_s29  ;;  %v947_v36 = vsel %vm521_vm7, %v2303_v21, %v2394_v15 }
 0x296   : > { %1028 = vrot.lane.b32.xlu1 %v844_v19, %s1859_s29 }
 0x298   : > { %v818_v20 = vpop.permute.xlu1 %817  ;;  %v940_v24 = vpop.permute.xlu0 %939 }
 0x299   : > { %1108 = vrot.lane.b32.xlu0 %v965_v8, %s1859_s29  ;;  %v825_v27 = vsel %vm359_vm1, %v2332_v42, %v818_v20  ;;  %v882_v42 = vsel %vm440_vm4, %v2365_v59, %v876_v13 }
 0x29a   : > { %1042 = vrot.lane.b32.xlu1 %v864_v23, %s1859_s29 }
 0x29c   : > { %v858_v26 = vpop.permute.xlu1 %857  ;;  %v820_v28 = vpop.permute.xlu0 %819 }
 0x29d   : > { %1016 = vrot.lane.b32.xlu0 %v825_v27, %s1859_s29  ;;  %v826_v38 = vsel %vm359_vm1, %v818_v20, %v820_v28  ;;  %v865_v21 = vsel %vm413_vm3, %v2338_v45, %v858_v26 }
 0x29e   : > { %1056 = vrot.lane.b32.xlu1 %v881_v22, %s1859_s29 }
 0x2a0   : > { %v900_v30 = vpop.permute.xlu1 %899  ;;  %v860_v10 = vpop.permute.xlu0 %859 }
 0x2a1   : > { %1020 = vrot.lane.b32.xlu0 %v820_v28, %s1859_s29  ;;  %v866_v40 = vsel %vm413_vm3, %v858_v26, %v860_v10  ;;  %v908_v46 = vsel %vm467_vm5, %v2343_v47, %v900_v30  ;;  %v948_v47 = vsel %vm521_vm7, %v2394_v15, %v940_v24 }
 0x2a2   : > { %1070 = vrot.lane.b32.xlu1 %v907_v29, %s1859_s29 }
 0x2a4   : > { %v920_v31 = vpop.permute.xlu1 %919  ;;  %v902_v11 = vpop.permute.xlu0 %901 }
 0x2a5   : > { %1030 = vrot.lane.b32.xlu0 %v845_v32, %s1859_s29  ;;  %v909_v44 = vsel %vm467_vm5, %v900_v30, %v902_v11  ;;  %v928_v49 = vsel %vm494_vm6, %v2349_v50, %v920_v31  ;;  %v973_v50 = vld [vmem:[%s2716_s4] sm:$0xff]  ;;  %v910_v59 = vsel %vm467_vm5, %v902_v11, %v2283_v7 }
 0x2a6   : > { %1084 = vrot.lane.b32.xlu1 %v927_v33, %s1859_s29 }
 0x2a8   : > { %v960_v35 = vpop.permute.xlu1 %959  ;;  %v922_v45 = vpop.permute.xlu0 %921 }
 0x2a9   : > { %v929_v48 = vsel %vm494_vm6, %v920_v31, %v922_v45  ;;  %v968_v56 = vsel %vm548_vm8, %v2357_v54, %v960_v35  ;;  %v930_v60 = vsel %vm494_vm6, %v922_v45, %v2289_v16  ;;  %v974_v16 = vld [vmem:[%s2716_s4 + $0x8] sm:$0xff] }
 0x2aa   : > { %1098 = vrot.lane.b32.xlu1 %v947_v36, %s1859_s29 }
 0x2ac   : > { %v2432_v17 = vpop.permute.xlu1 %1004  ;;  %v962_v53 = vpop.permute.xlu0 %961 }
 0x2ad   : > { %v969_v55 = vsel %vm548_vm8, %v960_v35, %v962_v53  ;;  %v970_v7 = vsel %vm548_vm8, %v962_v53, %v2295_v12 }
 0x2ae   : > { %1112 = vrot.lane.b32.xlu1 %v967_v37, %s1859_s29 }
 0x2b0   : > { %v840_v14 = vpop.permute.xlu1 %839  ;;  %v2486_v62 = vpop.permute.xlu0 %1006 }
 0x2b1   : > { %1034 = vrot.lane.b32.xlu0 %v840_v14, %s1859_s29  ;;  %v846_v39 = vsel %vm386_vm2, %v838_v0, %v840_v14  ;;  %v1126_v45 = vsel %vm1120_vm9, %v2432_v17, %v2486_v62 }
 0x2b2   : > { %1018 = vrot.lane.b32.xlu1 %v826_v38, %s1859_s29 }
 0x2b4   : > { %v878_v41 = vpop.permute.xlu1 %877 }
 0x2b5   : > { %1044 = vrot.lane.b32.xlu0 %v865_v21, %s1859_s29  ;;  %v883_v25 = vsel %vm440_vm4, %v876_v13, %v878_v41 }
 0x2b6   : > { %1032 = vrot.lane.b32.xlu1 %v846_v39, %s1859_s29 }
 0x2b8   : > { %v942_v34 = vpop.permute.xlu1 %941 }
 0x2b9   : > { %1048 = vrot.lane.b32.xlu0 %v860_v10, %s1859_s29  ;;  %v949_v51 = vsel %vm521_vm7, %v940_v24, %v942_v34  ;;  %v950_v54 = vsel %vm521_vm7, %v942_v34, %v2293_v9 }
 0x2ba   : > { %1046 = vrot.lane.b32.xlu1 %v866_v40, %s1859_s29 }
 0x2bd   : > { %1058 = vrot.lane.b32.xlu0 %v882_v42, %s1859_s29 }
 0x2be   : > { %1060 = vrot.lane.b32.xlu1 %v883_v25, %s1859_s29 }
 0x2bf   : > { %v1065_v43 = vpop.permute.xlu1 %1064 }
 0x2c1   : > { %1062 = vrot.lane.b32.xlu0 %v878_v41, %s1859_s29 }
 0x2c2   : > { %1074 = vrot.lane.b32.xlu1 %v909_v44, %s1859_s29  ;;  %v2538_v44 = vld [vmem:[%s2715_s3] ss:$8 sps:$4 sm:$0xff]  }
 0x2c5   : > { %1072 = vrot.lane.b32.xlu0 %v908_v46, %s1859_s29 }
 0x2c6   : > { %1088 = vrot.lane.b32.xlu1 %v929_v48, %s1859_s29 }
 0x2c7   : > { %v2469_v52 = vpop.permute.xlu1 %1092 }
 0x2c9   : > { %1086 = vrot.lane.b32.xlu0 %v928_v49, %s1859_s29  ;;  %v1125_v49 = vsel %vm1120_vm9, %v2363_v58, %v2432_v17 }
 0x2ca   : > { %1102 = vrot.lane.b32.xlu1 %v949_v51, %s1859_s29 }
 0x2cb   : > { %v1009_v57 = vpop.permute.xlu1 %1008 }
 0x2cd   : > { %1100 = vrot.lane.b32.xlu0 %v948_v47, %s1859_s29 }
 0x2ce   : > { %1116 = vrot.lane.b32.xlu1 %v969_v55, %s1859_s29 }
 0x2d0   : > { %v1037_v61 = vpop.permute.xlu1 %1036 }
 0x2d1   : > { %1114 = vrot.lane.b32.xlu0 %v968_v56, %s1859_s29 }
 0x2d2   : > { %977 = vperm.xlu1 %1727, %v973_v50  }
 0x2d4   : > { %v1011_v0 = vpop.permute.xlu1 %1010 }
 0x2d5   : > { %1076 = vrot.lane.b32.xlu0 %v910_v59, %s1859_s29  ;;  %v1127_v12 = vsel %vm1120_vm9, %v1009_v57, %v1011_v0 }
 0x2d7   : > { %v1051_v1 = vpop.permute.xlu0 %1050 }
 0x2d8   : > { %v2497_v5 = vpop.permute.xlu1 %1026 }
 0x2d9   : > { %1090 = vrot.lane.b32.xlu0 %v930_v60, %s1859_s29 }
 0x2dc   : > { %v1039_v3 = vpop.permute.xlu1 %1038 }
 0x2dd   : > { %1104 = vrot.lane.b32.xlu0 %v950_v54, %s1859_s29  ;;  %v1139_v27 = vsel %vm1120_vm9, %v1037_v61, %v1039_v3 }
 0x2df   : > { %v1079_v4 = vpop.permute.xlu0 %1078 }
 0x2e0   : > { %v2499_v13 = vpop.permute.xlu1 %1054 }
 0x2e1   : > { %1118 = vrot.lane.b32.xlu0 %v970_v7, %s1859_s29 }
 0x2e5   : > { %982 = vperm.xlu0 %1726, %v974_v16  }
 0x2e7   : > { %v1107_v2 = vpop.permute.xlu0 %1106 }
 0x2eb   : > { %v1023_v9 = vpop.permute.xlu0 %1022 }
 0x2ef   : > { %v1013_v6 = vpop.permute.xlu0 %1012 }
 0x2f0   : > { %v1128_v15 = vsel %vm1120_vm9, %v1011_v0, %v1013_v6 }
 0x2f1   : > { %1234 = vmatprep.subr.bf16.mxu1 %v1128_v15 }
 0x2f2   : > { %1235 = vmatpush1.bf16.msra.mxu1 %v1127_v12 }
 0x2f3   : > { %v1025_v18 = vpop.permute.xlu0 %1024 }
 0x2f4   : > { %v1133_v19 = vsel %vm1120_vm9, %v1023_v9, %v1025_v18  ;;  %v1067_v20 = vpop.permute.xlu1 %1066  ;;  %v1134_v8 = vsel %vm1120_vm9, %v1025_v18, %v2497_v5 }
 0x2f5   : > { %1236 = vmatprep.subr.bf16.mxu1 %v1134_v8  ;;  %v1151_v35 = vsel %vm1120_vm9, %v1065_v43, %v1067_v20 }
 0x2f6   : > { %1237 = vmatpush1.bf16.msra.mxu1 %v1133_v19 }
 0x2f7   : > { %v2506_v23 = vpop.permute.xlu0 %1040 }
 0x2f8   : > { %v2508_v24 = vpop.permute.xlu1 %1082  ;;  %v1140_v26 = vsel %vm1120_vm9, %v1039_v3, %v2506_v23 }
 0x2f9   : > { %1238 = vmatprep.subr.bf16.mxu1 %v1140_v26 }
 0x2fa   : > { %1239 = vmatpush1.bf16.msra.mxu1 %v1139_v27 }
 0x2fb   : > { %v1053_v22 = vpop.permute.xlu0 %1052 }
 0x2fc   : > { %v1145_v28 = vsel %vm1120_vm9, %v1051_v1, %v1053_v22  ;;  %v1095_v30 = vpop.permute.xlu1 %1094  ;;  %v1146_v29 = vsel %vm1120_vm9, %v1053_v22, %v2499_v13 }
 0x2fd   : > { %1240 = vmatprep.subr.bf16.mxu1 %v1146_v29  ;;  %v1163_v40 = vsel %vm1120_vm9, %v2469_v52, %v1095_v30 }
 0x2fe   : > { %1241 = vmatpush1.bf16.msra.mxu1 %v1145_v28 }
 0x2ff   : > { %v2516_v31 = vpop.permute.xlu0 %1068 }
 0x300   : > { %v2518_v32 = vpop.permute.xlu1 %1110  ;;  %v1152_v33 = vsel %vm1120_vm9, %v1067_v20, %v2516_v31 }
 0x301   : > { %1242 = vmatprep.subr.bf16.mxu1 %v1152_v33 }
 0x302   : > { %1243 = vmatpush1.bf16.msra.mxu1 %v1151_v35 }
 0x303   : > { %v1081_v36 = vpop.permute.xlu0 %1080 }
 0x304   : > { %v1157_v37 = vsel %vm1120_vm9, %v1079_v4, %v1081_v36  ;;  %v1015_v14 = vpop.permute.xlu1 %1014  ;;  %v1158_v38 = vsel %vm1120_vm9, %v1081_v36, %v2508_v24 }
 0x305   : > { %1244 = vmatprep.subr.bf16.mxu1 %v1158_v38  ;;  %v1129_v43 = vsel %vm1120_vm9, %v1013_v6, %v1015_v14 }
 0x306   : > { %1245 = vmatpush1.bf16.msra.mxu1 %v1157_v37 }
 0x307   : > { %v2526_v21 = vpop.permute.xlu0 %1096 }
 0x308   : > { %v1029_v39 = vpop.permute.xlu1 %1028  ;;  %v1164_v10 = vsel %vm1120_vm9, %v1095_v30, %v2526_v21 }
 0x309   : > { %1246 = vmatprep.subr.bf16.mxu1 %v1164_v10  ;;  %v1135_v50 = vsel %vm1120_vm9, %v2497_v5, %v1029_v39 }
 0x30a   : > { %1247 = vmatpush1.bf16.msra.mxu1 %v1163_v40 }
 0x30b   : > { %v1109_v41 = vpop.permute.xlu0 %1108 }
 0x30c   : > { %v1169_v11 = vsel %vm1120_vm9, %v1107_v2, %v1109_v41  ;;  %v1043_v42 = vpop.permute.xlu1 %1042  ;;  %v1170_v25 = vsel %vm1120_vm9, %v1109_v41, %v2518_v32 }
 0x30d   : > { %1248 = vmatprep.subr.bf16.mxu1 %v1170_v25  ;;  %v1141_v54 = vsel %vm1120_vm9, %v2506_v23, %v1043_v42 }
 0x30e   : > { %1249 = vmatpush1.bf16.msra.mxu1 %v1169_v11 }
 0x30f   : > { %v1017_v46 = vpop.permute.xlu0 %1016  ;;  %1318 = vmatprep.subr.bf16.mxu1 %v1126_v45 }
 0x310   : > { %v1057_v34 = vpop.permute.xlu1 %1056  ;;  %v1130_v48 = vsel %vm1120_vm9, %v1015_v14, %v1017_v46 }
 0x311   : > { %1265 = vmatmul.mubr.bf16.vlgmr.msra.gmra.mrb[4].mxu1 %v2538_v44  ;;  %1277 = vmatprep.subr.bf16.mxu0 %v1130_v48  ;;  %v1147_v9 = vsel %vm1120_vm9, %v2499_v13, %v1057_v34 }
 0x312   : > { %1278 = vmatpush1.bf16.msra.mxu0 %v1129_v43  ;;  %1319 = vmatpush1.bf16.msra.mxu1 %v1125_v49 }
 0x313   : > { %v1021_v51 = vpop.permute.xlu0 %1020  ;;  %1657 = vmatprep.mubr.msk.bf16.mxu1 %vm584_vm0, %v2378_v63 }
 0x314   : > { %v1071_v53 = vpop.permute.xlu1 %1070 }
 0x315   : > { %v1153_v8 = vsel %vm1120_vm9, %v2516_v31, %v1071_v53 }
 0x317   : > { %v1031_v47 = vpop.permute.xlu0 %1030 }
 0x318   : > { %v1085_v52 = vpop.permute.xlu1 %1084  ;;  %v1136_v55 = vsel %vm1120_vm9, %v1029_v39, %v1031_v47 }
 0x319   : > { %1279 = vmatprep.subr.bf16.mxu0 %v1136_v55  ;;  %v1159_v26 = vsel %vm1120_vm9, %v2508_v24, %v1085_v52 }
 0x31a   : > { %1280 = vmatpush1.bf16.msra.mxu0 %v1135_v50 }
 0x31c   : > { %v1099_v58 = vpop.permute.xlu1 %1098 }
 0x31d   : > { %v1165_v28 = vsel %vm1120_vm9, %v2526_v21, %v1099_v58 }
 0x320   : > { %v1113_v17 = vpop.permute.xlu1 %1112 }
 0x321   : > { %v1171_v33 = vsel %vm1120_vm9, %v2518_v32, %v1113_v17 }
 0x323   : > { %v1035_v56 = vpop.permute.xlu0 %1034 }
 0x324   : > { %v1019_v57 = vpop.permute.xlu1 %1018 }
 0x325   : > { %v1131_v59 = vsel %vm1120_vm9, %v1017_v46, %v1019_v57  ;;  %v1132_v60 = vsel %vm1120_vm9, %v1019_v57, %v1021_v51 }
 0x326   : > { %1320 = vmatprep.subr.bf16.mxu1 %v1132_v60 }
 0x327   : > { %v1045_v63 = vpop.permute.xlu0 %1044  ;;  %1321 = vmatpush1.bf16.msra.mxu1 %v1131_v59 }
 0x328   : > { %v1033_v61 = vpop.permute.xlu1 %1032  ;;  %v1142_v62 = vsel %vm1120_vm9, %v1043_v42, %v1045_v63 }
 0x329   : > { %v1137_v0 = vsel %vm1120_vm9, %v1031_v47, %v1033_v61  ;;  %1281 = vmatprep.subr.bf16.mxu0 %v1142_v62  ;;  %v1138_v1 = vsel %vm1120_vm9, %v1033_v61, %v1035_v56 }
 0x32a   : > { %1282 = vmatpush1.bf16.msra.mxu0 %v1141_v54  ;;  %1322 = vmatprep.subr.bf16.mxu1 %v1138_v1 }
 0x32b   : > { %v1049_v7 = vpop.permute.xlu0 %1048  ;;  %1323 = vmatpush1.bf16.msra.mxu1 %v1137_v0 }
 0x32c   : > { %v1047_v16 = vpop.permute.xlu1 %1046 }
 0x32d   : > { %v1143_v4 = vsel %vm1120_vm9, %v1045_v63, %v1047_v16  ;;  %v1144_v5 = vsel %vm1120_vm9, %v1047_v16, %v1049_v7  ;;  %v1741_v16 = vld [vmem:[%s2000_s13] sm:$0xff] }
 0x32e   : > { %1324 = vmatprep.subr.bf16.mxu1 %v1144_v5  ;;  %v1362_v5 = vunpack.c.h.bf16 %v1741_v16 }
 0x32f   : > { %v1059_v2 = vpop.permute.xlu0 %1058  ;;  %1325 = vmatpush1.bf16.msra.mxu1 %v1143_v4  ;;  %v1361_v4 = vunpack.c.l.bf16 %v1741_v16 }
 0x330   : > { %v1148_v3 = vsel %vm1120_vm9, %v1057_v34, %v1059_v2  ;;  %v1061_v6 = vpop.permute.xlu1 %1060 }
 0x331   : > { %1283 = vmatprep.subr.bf16.mxu0 %v1148_v3  ;;  %v1149_v18 = vsel %vm1120_vm9, %v1059_v2, %v1061_v6 }
 0x332   : > { %1284 = vmatpush1.bf16.msra.mxu0 %v1147_v9 }
 0x333   : > { %v1063_v15 = vpop.permute.xlu0 %1062 }
 0x334   : > { %v1150_v12 = vsel %vm1120_vm9, %v1061_v6, %v1063_v15  ;;  %v1075_v30 = vpop.permute.xlu1 %1074  ;;  %v1742_v6 = vld [vmem:[%s2000_s13 + $0x1c] sm:$0xff] }
 0x335   : > { %1326 = vmatprep.subr.bf16.mxu1 %v1150_v12  ;;  %v1368_v15 = vunpack.c.l.bf16 %v1742_v6 }
 0x336   : > { %1327 = vmatpush1.bf16.msra.mxu1 %v1149_v18 }
 0x337   : > { %v1073_v19 = vpop.permute.xlu0 %1072 }
 0x338   : > { %v1154_v20 = vsel %vm1120_vm9, %v1071_v53, %v1073_v19  ;;  %v1089_v24 = vpop.permute.xlu1 %1088  ;;  %v1155_v37 = vsel %vm1120_vm9, %v1073_v19, %v1075_v30 }
 0x339   : > { %1285 = vmatprep.subr.bf16.mxu0 %v1154_v20  ;;  %v1369_v20 = vunpack.c.h.bf16 %v1742_v6 }
 0x33a   : > { %1286 = vmatpush1.bf16.msra.mxu0 %v1153_v8 }
 0x33b   : > { %v1087_v23 = vpop.permute.xlu0 %1086 }
 0x33c   : > { %v1160_v13 = vsel %vm1120_vm9, %v1085_v52, %v1087_v23  ;;  %v1161_v21 = vsel %vm1120_vm9, %v1087_v23, %v1089_v24  ;;  %v1103_v39 = vpop.permute.xlu1 %1102 }
 0x33d   : > { %1287 = vmatprep.subr.bf16.mxu0 %v1160_v13 }
 0x33e   : > { %1288 = vmatpush1.bf16.msra.mxu0 %v1159_v26 }
 0x33f   : > { %v1101_v27 = vpop.permute.xlu0 %1100 }
 0x340   : > { %v1166_v22 = vsel %vm1120_vm9, %v1099_v58, %v1101_v27  ;;  %v1167_v40 = vsel %vm1120_vm9, %v1101_v27, %v1103_v39  ;;  %v1117_v41 = vpop.permute.xlu1 %1116 }
 0x341   : > { %1289 = vmatprep.subr.bf16.mxu0 %v1166_v22 }
 0x342   : > { %1290 = vmatpush1.bf16.msra.mxu0 %v1165_v28 }
 0x343   : > { %v1115_v29 = vpop.permute.xlu0 %1114 }
 0x344   : > { %v1172_v31 = vsel %vm1120_vm9, %v1113_v17, %v1115_v29  ;;  %v1173_v25 = vsel %vm1120_vm9, %v1115_v29, %v1117_v41  ;;  %v1743_v29 = vld [vmem:[%s2000_s13 + $0x8] sm:$0xff] }
 0x345   : > { %1291 = vmatprep.subr.bf16.mxu0 %v1172_v31  ;;  %v1363_v31 = vunpack.c.l.bf16 %v1743_v29 }
 0x346   : > { %1292 = vmatpush1.bf16.msra.mxu0 %v1171_v33  ;;  %v1364_v33 = vunpack.c.h.bf16 %v1743_v29 }
 0x347   : > { %v1077_v35 = vpop.permute.xlu0 %1076 }
 0x348   : > { %v1156_v36 = vsel %vm1120_vm9, %v1075_v30, %v1077_v35 }
 0x349   : > { %1308 = vmatmul.mubr.bf16.vlgmr.msra.gmra.mrb[8].mxu0 %v2538_v44  ;;  %1328 = vmatprep.subr.bf16.mxu1 %v1156_v36 }
 0x34a   : > { %1329 = vmatpush1.bf16.msra.mxu1 %v1155_v37 }
 0x34b   : > { %v1091_v14 = vpop.permute.xlu0 %1090 }
 0x34c   : > { %v1162_v38 = vsel %vm1120_vm9, %v1089_v24, %v1091_v14 }
 0x34d   : > { %1330 = vmatprep.subr.bf16.mxu1 %v1162_v38 }
 0x34e   : > { %1331 = vmatpush1.bf16.msra.mxu1 %v1161_v21 }
 0x34f   : > { %v1105_v32 = vpop.permute.xlu0 %1104 }
 0x350   : > { %v1168_v10 = vsel %vm1120_vm9, %v1103_v39, %v1105_v32  ;;  %v1744_v32 = vld [vmem:[%s2000_s13 + $0x10] sm:$0xff] }
 0x351   : > { %1332 = vmatprep.subr.bf16.mxu1 %v1168_v10  ;;  %v978_v45 = vpop.permute.xlu1 %977  ;;  %v1365_v10 = vunpack.c.l.bf16 %v1744_v32 }
 0x352   : > { %1333 = vmatpush1.bf16.msra.mxu1 %v1167_v40  ;;  %v1366_v40 = vunpack.c.h.bf16 %v1744_v32 }
 0x353   : > { %v1119_v11 = vpop.permute.xlu0 %1118 }
 0x354   : > { %v1174_v42 = vsel %vm1120_vm9, %v1117_v41, %v1119_v11  ;;  %v1745_v11 = vld [vmem:[%s2000_s13 + $0x18] sm:$0xf] }
 0x355   : > { %1334 = vmatprep.subr.bf16.mxu1 %v1174_v42  ;;  %v1367_v42 = vunpack.c.l.bf16 %v1745_v11 }
 0x356   : > { %1335 = vmatpush1.bf16.msra.mxu1 %v1173_v25 }
 0x359   : > { %1351 = vmatmul.mubr.bf16.vlgmr.msra.gmra.mrb[8].mxu1 %v2538_v44 }
 0x364   : > { %v983_v53 = vpop.permute.xlu0 %982 }
 0x3e4   : > { %v1266_v46 = vpop.f32.mrb[4].mxu1 }
 0x3e5   : > { %v1267_v34 = vadd.f32 %v1266_v46, %v978_v45  ;;  %v1268_v48 = vpop.f32.mrb[5].mxu1 }
 0x3e6   : > { %v1269_v49 = vadd.f32 %v1268_v48, %v978_v45  ;;  %v1270_v43 = vpop.f32.mrb[6].mxu1  ;;  %v1746_v48 = vld [vmem:[%s2000_s13 + $0x24] sm:$0xff] }
 0x3e7   : > { %v1272_v51 = vpop.f32.mrb[7].mxu1  ;;  %1387 = vrot.lane.b32.xlu1 %v1267_v34, %s1859_s29  ;;  %v1271_v47 = vadd.f32 %v1270_v43, %v983_v53 }
 0x3e8   : > { %1389 = vrot.lane.b32.xlu0 %v1269_v49, %s1859_s29  ;;  %v1273_v52 = vadd.f32 %v1272_v51, %v983_v53  ;;  %v1370_v49 = vunpack.c.l.bf16 %v1746_v48 }
 0x3eb   : > { %1399 = vrot.lane.b32.xlu1 %v1271_v47, %s1859_s29 }
 0x3ec   : > { %1401 = vrot.lane.b32.xlu0 %v1273_v52, %s1859_s29  ;;  %v1371_v52 = vunpack.c.h.bf16 %v1746_v48 }
 0x41c   : > { %v1309_v55 = vpop.f32.mrb[8].mxu0 }
 0x41d   : > { %v1310_v44 = vadd.f32 %v1309_v55, %v978_v45  ;;  %v1311_v50 = vpop.f32.mrb[9].mxu0 }
 0x41e   : > { %v1312_v58 = vadd.f32 %v1311_v50, %v978_v45  ;;  %v1313_v17 = vpop.f32.mrb[10].mxu0 }
 0x41f   : > { %v1315_v56 = vpop.f32.mrb[11].mxu0  ;;  %1391 = vrot.lane.b32.xlu1 %v1310_v44, %s1859_s29  ;;  %v1314_v54 = vadd.f32 %v1313_v17, %v983_v53 }
 0x420   : > { %1393 = vrot.lane.b32.xlu0 %v1312_v58, %s1859_s29  ;;  %v1316_v0 = vadd.f32 %v1315_v56, %v983_v53  ;;  %v1747_v56 = vld [vmem:[%s2000_s13 + $0x2c] sm:$0xff] }
 0x42c   : > { %v1352_v57 = vpop.f32.mrb[8].mxu1 }
 0x42d   : > { %v1353_v59 = vadd.f32 %v1352_v57, %v978_v45  ;;  %v1354_v60 = vpop.f32.mrb[9].mxu1  ;;  %v1372_v57 = vunpack.c.l.bf16 %v1747_v56 }
 0x42e   : > { %v1355_v63 = vadd.f32 %v1354_v60, %v978_v45  ;;  %v1356_v61 = vpop.f32.mrb[10].mxu1 }
 0x42f   : > { %v1358_v62 = vpop.f32.mrb[11].mxu1  ;;  %1395 = vrot.lane.b32.xlu1 %v1353_v59, %s1859_s29  ;;  %v1357_v1 = vadd.f32 %v1356_v61, %v983_v53 }
 0x430   : > { %1397 = vrot.lane.b32.xlu0 %v1355_v63, %s1859_s29  ;;  %v1359_v7 = vadd.f32 %v1358_v62, %v983_v53  ;;  %v1373_v62 = vunpack.c.h.bf16 %v1747_v56 }
 0x433   : > { %1403 = vrot.lane.b32.xlu1 %v1314_v54, %s1859_s29 }
 0x434   : > { %1405 = vrot.lane.b32.xlu0 %v1316_v0, %s1859_s29  ;;  %v1748_v0 = vld [vmem:[%s2000_s13 + $0x34] sm:$0xf]  ;;  %s1664_s13 = smul.u32 96, %s1996_s28 }
 0x436   : > { %s2636_s26 = scalar_lea.vmem [#allocation6], %s1664_s13 }
 0x437   : > { %1407 = vrot.lane.b32.xlu1 %v1357_v1, %s1859_s29  ;;  %v1374_v1 = vunpack.c.l.bf16 %v1748_v0 }
 0x438   : > { %1409 = vrot.lane.b32.xlu0 %v1359_v7, %s1859_s29  ;;  %s1557_s29 = sshll.u32 %s2636_s26, 4  ;;  %s2664_s29 = int_to_ptr.vmem [resolvable:$true] %s1557_s29 }
 0x439   : > { %s1779_s7 = scalar_lea.vmem %s2664_s29, 1536  ;;  %p1786_p8 = scmp.lt.s32.totalorder %s2664_s29, %s1784_s19 }
 0x43a   : > { %p1780_p6 = scmp.ne.s32.totalorder %s2664_s29, %s1779_s7  ;;  %p1787_p10 = scmp.lt.s32.totalorder %s1785_s10, %s1779_s7 }
 0x43c   : > { %p1781_p12 = pnand %p1780_p6, %p2724_p11  ;;  %p1788_p0 = por %p1787_p10, %p1786_p8 }
 0x43e   : > { %p1782_p13 = pneg %p1781_p12 }
 0x440   : > { %p1789_p2 = pnand %p1788_p0, %p1782_p13 }
 0x459   : > { %v1388_v2 = vpop.permute.xlu1 %1387 }
 0x45a   : > { %v1436_v3 = vadd.f32 %v1388_v2, %v1361_v4  ;;  %v1390_v9 = vpop.permute.xlu0 %1389 }
 0x45b   : > { %v1412_v12 = vsel %vm1120_vm9, %v1388_v2, %v1390_v9 }
 0x45c   : > { %v1450_v18 = vmax.f32 %v1436_v3, 0.0  ;;  %v1437_v19 = vadd.f32 %v1412_v12, %v1362_v5 }
 0x45d   : > { %v1400_v8 = vpop.permute.xlu1 %1399 }
 0x45e   : > { %v1451_v23 = vmax.f32 %v1437_v19, 0.0  ;;  %v1443_v13 = vadd.f32 %v1400_v8, %v1368_v15  ;;  %v1402_v26 = vpop.permute.xlu0 %1401  ;;  %1478 = vrot.lane.b32.xlu1 %v1450_v18, %s1853_s18 }
 0x45f   : > { %v1417_v27 = vsel %vm1120_vm9, %v1400_v8, %v1402_v26 }
 0x460   : > { %v1444_v22 = vadd.f32 %v1417_v27, %v1369_v20  ;;  %1480 = vrot.lane.b32.xlu0 %v1451_v23, %s1853_s18  ;;  %v1457_v28 = vmax.f32 %v1443_v13, 0.0 }
 0x462   : > { %v1458_v30 = vmax.f32 %v1444_v22, 0.0 }
 0x464   : > { %1492 = vrot.lane.b32.xlu0 %v1457_v28, %s1853_s18  ;;  %1494 = vrot.lane.b32.xlu1 %v1458_v30, %s1853_s18 }
 0x491   : > { %v1392_v24 = vpop.permute.xlu1 %1391 }
 0x492   : > { %v1413_v35 = vsel %vm1120_vm9, %v1390_v9, %v1392_v24  ;;  %v1394_v36 = vpop.permute.xlu0 %1393 }
 0x493   : > { %v1438_v37 = vadd.f32 %v1413_v35, %v1363_v31  ;;  %v1414_v14 = vsel %vm1120_vm9, %v1392_v24, %v1394_v36 }
 0x494   : > { %v1439_v38 = vadd.f32 %v1414_v14, %v1364_v33 }
 0x495   : > { %v1452_v21 = vmax.f32 %v1438_v37, 0.0 }
 0x496   : > { %v1453_v39 = vmax.f32 %v1439_v38, 0.0 }
 0x497   : > { %1482 = vrot.lane.b32.xlu1 %v1452_v21, %s1853_s18 }
 0x498   : > { %1484 = vrot.lane.b32.xlu0 %v1453_v39, %s1853_s18 }
 0x4a1   : > { %v1396_v41 = vpop.permute.xlu1 %1395 }
 0x4a2   : > { %v1415_v25 = vsel %vm1120_vm9, %v1394_v36, %v1396_v41  ;;  %v1398_v45 = vpop.permute.xlu0 %1397 }
 0x4a3   : > { %v1440_v46 = vadd.f32 %v1415_v25, %v1365_v10  ;;  %v1416_v34 = vsel %vm1120_vm9, %v1396_v41, %v1398_v45  ;;  %v1442_v53 = vadd.f32 %v1398_v45, %v1367_v42 }
 0x4a4   : > { %v1441_v43 = vadd.f32 %v1416_v34, %v1366_v40 }
 0x4a5   : > { %v1454_v51 = vmax.f32 %v1440_v46, 0.0  ;;  %v1404_v47 = vpop.permute.xlu1 %1403  ;;  %v1456_v59 = vmax.f32 %v1442_v53, 0.0 }
 0x4a6   : > { %v1455_v55 = vmax.f32 %v1441_v43, 0.0  ;;  %v1418_v44 = vsel %vm1120_vm9, %v1402_v26, %v1404_v47  ;;  %v1406_v50 = vpop.permute.xlu0 %1405 }
 0x4a7   : > { %v1445_v58 = vadd.f32 %v1418_v44, %v1370_v49  ;;  %v1419_v17 = vsel %vm1120_vm9, %v1404_v47, %v1406_v50  ;;  %1486 = vrot.lane.b32.xlu1 %v1454_v51, %s1853_s18 }
 0x4a8   : > { %1488 = vrot.lane.b32.xlu0 %v1455_v55, %s1853_s18  ;;  %v1446_v63 = vadd.f32 %v1419_v17, %v1371_v52 }
 0x4a9   : > { %v1459_v60 = vmax.f32 %v1445_v58, 0.0  ;;  %v1408_v61 = vpop.permute.xlu1 %1407 }
 0x4aa   : > { %v1420_v54 = vsel %vm1120_vm9, %v1406_v50, %v1408_v61  ;;  %v1410_v7 = vpop.permute.xlu0 %1409  ;;  %v1460_v5 = vmax.f32 %v1446_v63, 0.0 }
 0x4ab   : > { %v1447_v16 = vadd.f32 %v1420_v54, %v1372_v57  ;;  %v1421_v4 = vsel %vm1120_vm9, %v1408_v61, %v1410_v7  ;;  %1490 = vrot.lane.b32.xlu1 %v1456_v59, %s1853_s18  ;;  %v1449_v9 = vadd.f32 %v1410_v7, %v1374_v1 }
 0x4ac   : > { %1496 = vrot.lane.b32.xlu0 %v1459_v60, %s1853_s18  ;;  %v1448_v3 = vadd.f32 %v1421_v4, %v1373_v62 }
 0x4ad   : > { %v1461_v2 = vmax.f32 %v1447_v16, 0.0  ;;  %v1463_v15 = vmax.f32 %v1449_v9, 0.0 }
 0x4ae   : > { %v1462_v6 = vmax.f32 %v1448_v3, 0.0 }
 0x4af   : > { %1498 = vrot.lane.b32.xlu1 %v1460_v5, %s1853_s18 }
 0x4b0   : > { %1500 = vrot.lane.b32.xlu0 %v1461_v2, %s1853_s18 }
 0x4b3   : > { %1502 = vrot.lane.b32.xlu1 %v1462_v6, %s1853_s18 }
 0x4b4   : > { %1504 = vrot.lane.b32.xlu0 %v1463_v15, %s1853_s18  ;;  %s1665_s18 = smul.u32 1536, %s1919_s25  ;;  %s1544_s25 = scalar_lea.sflag [#allocation5], %s1996_s28 }
 0x4b6   : > { %s2662_s15 = scalar_lea.hbm %s2718_s6, %s1665_s18 }
 0x4d0   : > { %v1479_v12 = vpop.permute.xlu1 %1478 }
 0x4d2   : > { %v1481_v18 = vpop.permute.xlu0 %1480 }
 0x4d3   : > { %v1507_v19 = vsel %vm440_vm4, %v1479_v12, %v1481_v18 }
 0x4d4   : > { %1531 = vst [vmem:[%s2636_s26] sm:$0xff] %v1507_v19 }
 0x4d6   : > { %v1493_v20 = vpop.permute.xlu0 %1492  ;;  %v1495_v8 = vpop.permute.xlu1 %1494 }
 0x4d7   : > { %v1513_v23 = vsel %vm440_vm4, %v1493_v20, %v1495_v8 }
 0x4d8   : > { %1537 = vst [vmem:[%s2636_s26 + $0x30] sm:$0xff] %v1513_v23 }
 0x509   : > { %v1483_v13 = vpop.permute.xlu1 %1482 }
 0x50a   : > { %v1508_v26 = vsel %vm440_vm4, %v1481_v18, %v1483_v13  ;;  %v1485_v27 = vpop.permute.xlu0 %1484 }
 0x50b   : > { %1532 = vst [vmem:[%s2636_s26 + $0x8] sm:$0xff] %v1508_v26  ;;  %v1509_v22 = vsel %vm440_vm4, %v1483_v13, %v1485_v27 }
 0x50c   : > { %1533 = vst [vmem:[%s2636_s26 + $0x10] sm:$0xff] %v1509_v22 }
 0x519   : > { %v1487_v28 = vpop.permute.xlu1 %1486 }
 0x51a   : > { %v1510_v30 = vsel %vm440_vm4, %v1485_v27, %v1487_v28  ;;  %v1489_v29 = vpop.permute.xlu0 %1488 }
 0x51b   : > { %1534 = vst [vmem:[%s2636_s26 + $0x18] sm:$0xff] %v1510_v30  ;;  %v1511_v31 = vsel %vm440_vm4, %v1487_v28, %v1489_v29 }
 0x51c   : > { %1535 = vst [vmem:[%s2636_s26 + $0x20] sm:$0xff] %v1511_v31 }
 0x51d   : > { %v1491_v33 = vpop.permute.xlu1 %1490 }
 0x51e   : > { %v1512_v24 = vsel %vm440_vm4, %v1489_v29, %v1491_v33  ;;  %v1497_v35 = vpop.permute.xlu0 %1496 }
 0x51f   : > { %1536 = vst [vmem:[%s2636_s26 + $0x28] sm:$0xff] %v1512_v24  ;;  %v1514_v36 = vsel %vm440_vm4, %v1495_v8, %v1497_v35 }
 0x520   : > { %1538 = vst [vmem:[%s2636_s26 + $0x38] sm:$0xff] %v1514_v36 }
 0x521   : > { %v1499_v37 = vpop.permute.xlu1 %1498 }
 0x522   : > { %v1515_v14 = vsel %vm440_vm4, %v1497_v35, %v1499_v37  ;;  %v1501_v38 = vpop.permute.xlu0 %1500 }
 0x523   : > { %1539 = vst [vmem:[%s2636_s26 + $0x40] sm:$0xff] %v1515_v14  ;;  %v1516_v21 = vsel %vm440_vm4, %v1499_v37, %v1501_v38 }
 0x524   : > { %1540 = vst [vmem:[%s2636_s26 + $0x48] sm:$0xff] %v1516_v21 }
 0x525   : > { %v1503_v39 = vpop.permute.xlu1 %1502 }
 0x526   : > { %v1517_v32 = vsel %vm440_vm4, %v1501_v38, %v1503_v39  ;;  %v1505_v10 = vpop.permute.xlu0 %1504 }
 0x527   : > { %1541 = vst [vmem:[%s2636_s26 + $0x50] sm:$0xff] %v1517_v32  ;;  %v1518_v40 = vsel %vm440_vm4, %v1503_v39, %v1505_v10 }
 0x528   : > { %1542 = vst [vmem:[%s2636_s26 + $0x58] sm:$0xff] %v1518_v40 }
 0x529   : > { %1792 = shalt.err (!%p1789_p2)
}
 0x52a   : > { %s1793_s12 = scalar_lea.hbm %s2662_s15, 1536  ;;  %s1797_s13 = scalar_lea.hbm %s2718_s6, 3072 }
 0x52b   : > { %p1794_p4 = scmp.ne.s32.totalorder %s2662_s15, %s1793_s12  ;;  %p1798_p9 = scmp.lt.u32.totalorder %s2662_s15, %s2718_s6 }
 0x52c   : > { %p1799_p1 = scmp.lt.u32.totalorder %s1797_s13, %s1793_s12  ;;  %p1801_p6 = scmp.lt.u32.totalorder %s1793_s12, %s2662_s15 }
 0x52d   : > { %p1795_p5 = pnand %p1794_p4, %p2724_p11 }
 0x52e   : > { %p1800_p3 = por %p1799_p1, %p1798_p9 }
 0x52f   : > { %p1796_p7 = pneg %p1795_p5 }
 0x530   : > { %p1802_p12 = por %p1801_p6, %p1800_p3 }
 0x532   : > { %p1803_p13 = pnand %p1802_p12, %p1796_p7 }
 0x534   : > { %1806 = shalt.err (!%p1803_p13)
}
 0x535   : > { %s1861_s11 = smov 768   ;;  %s1862_s14 = smov 48  }
 0x536   : > { %1668 = dma.vmem_to_hbm [thread:$0]  (%p2724_p11), %s2664_s29, 1536, %s2662_s15, %s1544_s25, %s1861_s11, %s1861_s11, %s1862_s14  }
 0x537 PF: > { %s1572_s7 = sand.u32 1, %s1833_s21   ;;  %p2725_p8 = scmp.ne.s32.totalorder %s2722_s9, 0 }
 0x538   : > { %p2726_p10 = scmp.ge.s32.totalorder %s1845_s24, 2  ;;  %s1573_s16 = scalar_lea.sflag [#allocation5], %s1572_s7 }
 0x53a   : > { %p1675_p0 = pnand %p2726_p10, %p2725_p8 }
 0x53c   : > { %1828 = dma.done.wait (!%p1675_p0), %s1573_s16, 1536  }
 0x53d   : > { %1830 = vsyncadd (!%p1675_p0), %s1573_s16, 4294965760  ;;  %p19_p2 = scmp.ge.s32.totalorder %s1923_s27, 4   ;;  %s2727_s21 = smov %s1837_s22 }
 0x53e   : > { %s2728_s22 = smov %s1841_s23  ;;  %s2729_s23 = smov %s1935_s30 }
 0x53f   : > { %s2730_s24 = smov %s1923_s27  ;;  %21 = sbr.rel (!%p19_p2) target bundleno = 5 (0x5), region = 89 }
 0x546   :  { %1578 = vsyncpa [#allocation4], 1 }
 0x547   :  { %1580 = vsyncpa [#allocation4 + $0x1], 1 }
 0x548   :  { %1581 = vsyncpa [#allocation5], 1 }
 0x549   :  { %1583 = vsyncpa [#allocation5 + $0x1], 1 }

</bundles_post_ra>
